<compile_context>
chip_gen: v7x
topology: tpu7x:2x2x1
jax: 0.10.0
libtpu: 0.0.40
codegen_flags: <defaults>
</compile_context>

<pallas_src>
import jax
import jax.numpy as jnp
from jax.experimental import pallas as pl
from jax.experimental.pallas import tpu as pltpu

NUM_HIGHWAY = 4


def _make_kernel(N, T, Din, H, K, Kmax, Opost):
    NT = N * T
    KH = K * H
    G3 = 3 * H
    L = Kmax // 2  # global left pad of the time axis used for the conv bank
    f32 = jnp.float32
    bf16 = jnp.bfloat16

    def kernel(xp_ref,
               wbank_ref, bbank_ref,
               wp1_ref, bp1_ref, wp2_ref, bp2_ref,
               wpre_ref,
               whw_ref, bhw_ref,
               wih_f_ref, whh_f_ref, bih_f_ref, bhh_f_ref,
               wih_b_ref, whh_b_ref, bih_b_ref, bhh_b_ref,
               wprojf_ref, wprojb_ref, bproj_ref,
               out_ref,
               gif_sc, gib_sc, hf_sc, hb_sc, gf_sc, gb_sc):
        # Flat row r = n*T + t (N-major keeps T=8-aligned sublane tiles).
        # Masks used to zero contributions that would cross a batch boundary
        # when shifting rows by +-1 along the flattened (N*T) axis.
        t_of_row = jax.lax.broadcasted_iota(jnp.int32, (NT, 1), 0) % T
        not_first = t_of_row >= 1            # row has a valid (t-1) neighbour
        not_last = t_of_row < (T - 1)        # row has a valid (t+1) neighbour

        def shift_down(x):   # y[t] = x[t-1], zero at t == 0   (per batch element)
            return jnp.where(not_first, pltpu.roll(x, 1, 0), 0.0)

        def shift_up(x):     # y[t] = x[t+1], zero at t == T-1 (per batch element)
            return jnp.where(not_last, pltpu.roll(x, NT - 1, 0), 0.0)

        # ---- Conv1d bank (kernel sizes 1..K) + folded BN + ReLU, fused --------
        # wbank is packed (Kmax, Din, K*H) with zeros outside each kernel's taps,
        # so the whole bank is just Kmax wide matmuls into one (NT, K*H) buffer.
        x_orig = xp_ref[:, L:L + T, :].reshape(NT, Din)            # f32 residual
        acc = jnp.zeros((NT, KH), f32)
        for m in range(Kmax):
            x_m = xp_ref[:, m:m + T, :].astype(bf16).reshape(NT, Din)
            acc = acc + jnp.dot(x_m, wbank_ref[m], preferred_element_type=f32)
        bank = jax.nn.relu(acc + bbank_ref[...])                   # (NT, KH)

        # ---- MaxPool1d(kernel=2, stride=1, left pad) --------------------------
        # bank >= 0 after ReLU, so zero-fill at t==0 equals the original
        # left-edge replication.
        mp = jnp.maximum(bank, shift_down(bank))
        mpb = mp.astype(bf16)

        # ---- Conv1d projection 1: KH -> H, kernel 3, folded BN, ReLU ----------
        # 3-tap conv as 3 full matmuls on the unshifted input; shift the per-tap
        # results (matmul is per-row) instead of building a padded input copy.
        p0 = jnp.dot(mpb, wp1_ref[0], preferred_element_type=f32)
        p1 = jnp.dot(mpb, wp1_ref[1], preferred_element_type=f32)
        p2 = jnp.dot(mpb, wp1_ref[2], preferred_element_type=f32)
        y1 = jax.nn.relu(p1 + shift_down(p0) + shift_up(p2) + bp1_ref[...])
        y1b = y1.astype(bf16)

        # ---- Conv1d projection 2: H -> Din, kernel 3, folded BN (no ReLU) -----
        q0 = jnp.dot(y1b, wp2_ref[0], preferred_element_type=f32)
        q1 = jnp.dot(y1b, wp2_ref[1], preferred_element_type=f32)
        q2 = jnp.dot(y1b, wp2_ref[2], preferred_element_type=f32)
        y2 = q1 + shift_down(q0) + shift_up(q2) + bp2_ref[...]

        # ---- Residual with CBHG input + pre-highway Linear (Din -> H) ---------
        res = (y2 + x_orig).astype(bf16)
        h = jnp.dot(res, wpre_ref[...], preferred_element_type=f32)

        # ---- 4 highway layers (H and T branches fused: one (H,2H) matmul) -----
        for layer in range(NUM_HIGHWAY):
            hw2 = jnp.dot(h.astype(bf16), whw_ref[layer],
                          preferred_element_type=f32) + bhw_ref[layer]
            hh = jax.nn.relu(hw2[:, :H])
            tg = jax.nn.sigmoid(hw2[:, H:])
            h = hh * tg + h * (1.0 - tg)

        # ---- Bidirectional GRU (PyTorch gate equations, zero initial state) ---
        # Input-to-hidden gates hoisted out of the serial loop as two big
        # (NT,H)@(H,3H) matmuls; the loop only does the recurrent matmul.
        hb16 = h.astype(bf16)
        gif_sc[...] = (jnp.dot(hb16, wih_f_ref[...], preferred_element_type=f32)
                       + bih_f_ref[...]).reshape(N, T, G3)
        gib_sc[...] = (jnp.dot(hb16, wih_b_ref[...], preferred_element_type=f32)
                       + bih_b_ref[...]).reshape(N, T, G3)

        whh_f = whh_f_ref[...]; bhh_f = bhh_f_ref[...]
        whh_b = whh_b_ref[...]; bhh_b = bhh_b_ref[...]
        hf_sc[...] = jnp.zeros_like(hf_sc)
        hb_sc[...] = jnp.zeros_like(hb_sc)

        def gru_step(t_idx, gi_sc, h_sc, whh, bhh, out_sc):
            gi = gi_sc[:, pl.ds(t_idx, 1), :].reshape(N, G3)       # precomputed
            hprev = h_sc[...]                                       # f32 state
            gh = jnp.dot(hprev.astype(bf16), whh,
                         preferred_element_type=f32) + bhh
            r = jax.nn.sigmoid(gi[:, :H] + gh[:, :H])
            z = jax.nn.sigmoid(gi[:, H:2 * H] + gh[:, H:2 * H])
            n = jnp.tanh(gi[:, 2 * H:] + r * gh[:, 2 * H:])
            hnew = (1.0 - z) * n + z * hprev
            h_sc[...] = hnew
            out_sc[:, pl.ds(t_idx, 1), :] = hnew.reshape(N, 1, H)

        # Forward and backward directions are independent: interleave them in a
        # single time loop so the two small recurrent matmuls / EUP ops overlap.
        # TODO(synk): on v7x the two directions could instead run on separate
        # TensorCores (2-wide 'parallel' grid / core_map) for ~2x on this stage.
        @pl.loop(0, T)
        def _(t):
            gru_step(t, gif_sc, hf_sc, whh_f, bhh_f, gf_sc)
            gru_step(T - 1 - t, gib_sc, hb_sc, whh_b, bhh_b, gb_sc)

        # ---- Final projection: Linear(2H -> Opost), split weights (no concat) -
        out = (jnp.dot(gf_sc[...].reshape(NT, H).astype(bf16), wprojf_ref[...],
                       preferred_element_type=f32)
               + jnp.dot(gb_sc[...].reshape(NT, H).astype(bf16), wprojb_ref[...],
                         preferred_element_type=f32)
               + bproj_ref[...])
        out_ref[...] = out.reshape(N, T, Opost)

    return kernel


def _pack_params(params):
    """Pure glue: fold/concatenate parameters into MXU-friendly packed shapes."""
    K, Kmax, Din, H = params["wbank"].shape
    bf16, f32 = jnp.bfloat16, jnp.float32
    # (K, Kmax, Din, H) -> (Kmax, Din, K*H): one wide matmul per tap m.
    wbank = jnp.transpose(params["wbank"], (1, 2, 0, 3))
    wbank = wbank.reshape(Kmax, Din, K * H).astype(bf16)
    return dict(
        wbank=wbank,
        bbank=params["bbank"].reshape(1, K * H).astype(f32),
        wp1=params["wp1"].astype(bf16), bp1=params["bp1"].astype(f32),
        wp2=params["wp2"].astype(bf16), bp2=params["bp2"].astype(f32),
        wpre=params["wpre"].astype(bf16),
        # Highway H- and T-branches fused into a single (H, 2H) weight per layer.
        whw=jnp.concatenate([params["whwh"], params["whwt"]], axis=-1).astype(bf16),
        bhw=jnp.concatenate([params["bhwh"], params["bhwt"]], axis=-1).astype(f32),
        wih_f=params["wih_f"].astype(bf16), whh_f=params["whh_f"].astype(bf16),
        bih_f=params["bih_f"].astype(f32), bhh_f=params["bhh_f"].astype(f32),
        wih_b=params["wih_b"].astype(bf16), whh_b=params["whh_b"].astype(bf16),
        bih_b=params["bih_b"].astype(f32), bhh_b=params["bhh_b"].astype(f32),
        # Final projection split so gf/gb never need a lane-axis concatenate.
        wproj_f=params["wproj"][:H].astype(bf16),
        wproj_b=params["wproj"][H:].astype(bf16),
        bproj=params["bproj"].astype(f32),
    )


def post_processor_forward(spec, params, *, hidden_size, num_filters,
                           post_out_size, lengths=None):
    """input: N x T x dec_out_size   ->   output: N x T x post_out_size."""
    # lengths=None branch of the PyTorch module (projection applied to every frame).
    # TODO(synk): pack_padded_sequence/pad_packed_sequence branch not replicated;
    # it is numerically identical on valid frames.
    N, T, Din = spec.shape
    H, K, Opost = hidden_size, num_filters, post_out_size
    Kmax = K
    L = Kmax // 2
    xp = jnp.pad(spec.astype(jnp.float32),
                 ((0, 0), (L, Kmax - 1 - L), (0, 0)))     # global pad for conv bank

    p = _pack_params(params)
    inputs = (xp,
              p["wbank"], p["bbank"],
              p["wp1"], p["bp1"], p["wp2"], p["bp2"],
              p["wpre"],
              p["whw"], p["bhw"],
              p["wih_f"], p["whh_f"], p["bih_f"], p["bhh_f"],
              p["wih_b"], p["whh_b"], p["bih_b"], p["bhh_b"],
              p["wproj_f"], p["wproj_b"], p["bproj"])

    kernel = _make_kernel(N, T, Din, H, K, Kmax, Opost)
    vmem_spec = pl.BlockSpec(memory_space=pltpu.MemorySpace.VMEM)

    # Explicit scoped-VMEM budget: resident inputs + output + scratch, with headroom.
    resident = sum(int(a.size) * a.dtype.itemsize for a in inputs)
    resident += 4 * (N * T * Opost                       # output
                     + 2 * N * T * 3 * H + 2 * N * H     # GRU gate/state scratch
                     + 2 * N * T * H)                    # GRU output scratch
    vmem_limit = int(min(64 * 1024 * 1024, max(16 * 1024 * 1024, 8 * resident)))

    # TODO(synk): at realistic Tacotron T the conv/highway stage should become a
    # separate pallas_call tiled over time (halo = Kmax//2 + 2) so VMEM stays
    # bounded on v7x (64 MiB) and the time grid shards across TensorCores.
    return pl.pallas_call(
        kernel,
        out_shape=jax.ShapeDtypeStruct((N, T, Opost), jnp.float32),
        in_specs=[vmem_spec] * len(inputs),
        out_specs=vmem_spec,
        scratch_shapes=[
            pltpu.VMEM((N, T, 3 * H), jnp.float32),  # fwd GRU input gates (hoisted)
            pltpu.VMEM((N, T, 3 * H), jnp.float32),  # bwd GRU input gates (hoisted)
            pltpu.VMEM((N, H), jnp.float32),         # fwd GRU hidden state
            pltpu.VMEM((N, H), jnp.float32),         # bwd GRU hidden state
            pltpu.VMEM((N, T, H), jnp.float32),      # fwd GRU outputs
            pltpu.VMEM((N, T, H), jnp.float32),      # bwd GRU outputs
        ],
        compiler_params=pltpu.CompilerParams(vmem_limit_bytes=vmem_limit),
    )(*inputs)


def init_params(key, dec_out_size, hidden_size, post_out_size, num_filters):
    """Deterministic synthetic parameters (BN folded, eval-mode running stats)."""
    H, Din, K, Opost = hidden_size, dec_out_size, num_filters, post_out_size
    Kmax = K
    L = Kmax // 2
    eps = 1e-5
    bn_scale = 1.0 / jnp.sqrt(1.0 + eps)  # gamma=1, beta=0, mean=0, var=1
    keys = iter(jax.random.split(key, 64))

    def w(shape, scale=0.1):
        return jax.random.normal(next(keys), shape, jnp.float32) * scale

    wbank = jnp.zeros((K, Kmax, Din, H), jnp.float32)
    bbank = jnp.zeros((K, 1, H), jnp.float32)
    for kidx in range(K):
        ks = kidx + 1
        off = L - ks // 2
        wbank = wbank.at[kidx, off:off + ks].set(w((ks, Din, H)) * bn_scale)
        bbank = bbank.at[kidx].set(w((1, H), 0.01) * bn_scale)

    return dict(
        wbank=wbank, bbank=bbank,
        wp1=w((3, K * H, H)) * bn_scale, bp1=w((1, H), 0.01) * bn_scale,
        wp2=w((3, H, Din)) * bn_scale, bp2=w((1, Din), 0.01) * bn_scale,
        wpre=w((Din, H)),
        whwh=w((NUM_HIGHWAY, H, H)),
        bhwh=jnp.zeros((NUM_HIGHWAY, 1, H), jnp.float32),
        whwt=w((NUM_HIGHWAY, H, H)),
        bhwt=jnp.full((NUM_HIGHWAY, 1, H), -1.0, jnp.float32),  # highway gate bias
        wih_f=w((H, 3 * H)), whh_f=w((H, 3 * H)),
        bih_f=w((1, 3 * H), 0.01), bhh_f=w((1, 3 * H), 0.01),
        wih_b=w((H, 3 * H)), whh_b=w((H, 3 * H)),
        bih_b=w((1, 3 * H), 0.01), bhh_b=w((1, 3 * H), 0.01),
        wproj=w((2 * H, Opost)), bproj=w((1, Opost), 0.01),
    )


if __name__ == "__main__":
    dec_out_size = 16     # O_dec
    hidden_size = 32
    post_out_size = 24    # O_post
    num_filters = 4       # K
    N, T = 2, 8

    key = jax.random.PRNGKey(0)
    pkey, xkey = jax.random.split(key)
    params = init_params(pkey, dec_out_size, hidden_size, post_out_size, num_filters)
    spec = jax.random.normal(xkey, (N, T, dec_out_size), jnp.float32)

    out = post_processor_forward(spec, params,
                                 hidden_size=hidden_size,
                                 num_filters=num_filters,
                                 post_out_size=post_out_size)
    out = jax.block_until_ready(out)
    assert out.shape == (N, T, post_out_size), out.shape
    assert bool(jnp.all(jnp.isfinite(out)))
    print("KERNEL_OK")
</pallas_src>

<mosaic_0001>
module attributes {stable_mosaic.version = 11 : i64} {
  func.func @kernel(%arg0: memref<2x11x16xf32, #tpu.memory_space<vmem>>, %arg1: memref<4x16x128xbf16, #tpu.memory_space<vmem>>, %arg2: memref<1x128xf32, #tpu.memory_space<vmem>>, %arg3: memref<3x128x32xbf16, #tpu.memory_space<vmem>>, %arg4: memref<1x32xf32, #tpu.memory_space<vmem>>, %arg5: memref<3x32x16xbf16, #tpu.memory_space<vmem>>, %arg6: memref<1x16xf32, #tpu.memory_space<vmem>>, %arg7: memref<16x32xbf16, #tpu.memory_space<vmem>>, %arg8: memref<4x32x64xbf16, #tpu.memory_space<vmem>>, %arg9: memref<4x1x64xf32, #tpu.memory_space<vmem>>, %arg10: memref<32x96xbf16, #tpu.memory_space<vmem>>, %arg11: memref<32x96xbf16, #tpu.memory_space<vmem>>, %arg12: memref<1x96xf32, #tpu.memory_space<vmem>>, %arg13: memref<1x96xf32, #tpu.memory_space<vmem>>, %arg14: memref<32x96xbf16, #tpu.memory_space<vmem>>, %arg15: memref<32x96xbf16, #tpu.memory_space<vmem>>, %arg16: memref<1x96xf32, #tpu.memory_space<vmem>>, %arg17: memref<1x96xf32, #tpu.memory_space<vmem>>, %arg18: memref<32x24xbf16, #tpu.memory_space<vmem>>, %arg19: memref<32x24xbf16, #tpu.memory_space<vmem>>, %arg20: memref<1x24xf32, #tpu.memory_space<vmem>>, %arg21: memref<2x8x24xf32, #tpu.memory_space<vmem>>, %arg22: memref<2x8x96xf32, #tpu.memory_space<vmem>>, %arg23: memref<2x8x96xf32, #tpu.memory_space<vmem>>, %arg24: memref<2x32xf32, #tpu.memory_space<vmem>>, %arg25: memref<2x32xf32, #tpu.memory_space<vmem>>, %arg26: memref<2x8x32xf32, #tpu.memory_space<vmem>>, %arg27: memref<2x8x32xf32, #tpu.memory_space<vmem>>) attributes {dimension_semantics = [], scalar_prefetch = 0 : i64, scratch_operands = 6 : i64, tpu.core_type = #tpu.core_type<tc>} {
    %0 = tpu.iota {dimensions = array<i32: 0>} : vector<16x1xi32>
    %c8_i32 = arith.constant 8 : i32
    %c0_i32 = arith.constant 0 : i32
    %1 = arith.cmpi eq, %c8_i32, %c0_i32 : i32
    %c1_i32 = arith.constant 1 : i32
    %2 = arith.select %1, %c1_i32, %c8_i32 : i32
    %3 = vector.broadcast %2 : i32 to vector<16x1xi32>
    %4 = arith.remsi %0, %3 : vector<16x1xi32>
    %c0_i32_0 = arith.constant 0 : i32
    %5 = vector.broadcast %c0_i32_0 : i32 to vector<16x1xi32>
    %6 = arith.cmpi ne, %4, %5 : vector<16x1xi32>
    %c0_i32_1 = arith.constant 0 : i32
    %7 = vector.broadcast %c0_i32_1 : i32 to vector<16x1xi32>
    %8 = arith.cmpi slt, %4, %7 : vector<16x1xi32>
    %c0_i32_2 = arith.constant 0 : i32
    %9 = arith.cmpi slt, %2, %c0_i32_2 : i32
    %10 = vector.broadcast %9 : i1 to vector<16x1xi1>
    %11 = vector.broadcast %10 : vector<16x1xi1> to vector<16x1xi1>
    %12 = arith.xori %8, %11 : vector<16x1xi1>
    %13 = arith.andi %12, %6 : vector<16x1xi1>
    %14 = vector.broadcast %2 : i32 to vector<16x1xi32>
    %15 = arith.addi %4, %14 : vector<16x1xi32>
    %16 = arith.select %13, %15, %4 : vector<16x1xi1>, vector<16x1xi32>
    %c1_i32_3 = arith.constant 1 : i32
    %17 = vector.broadcast %c1_i32_3 : i32 to vector<16x1xi32>
    %18 = arith.cmpi sge, %16, %17 : vector<16x1xi32>
    %c7_i32 = arith.constant 7 : i32
    %19 = vector.broadcast %c7_i32 : i32 to vector<16x1xi32>
    %20 = arith.cmpi slt, %16, %19 : vector<16x1xi32>
    %c0 = arith.constant 0 : index
    %c2 = arith.constant 2 : index
    %c0_4 = arith.constant 0 : index
    %21 = vector.load %arg0[%c0, %c2, %c0_4] : memref<2x11x16xf32, #tpu.memory_space<vmem>>, vector<2x8x16xf32>
    %22 = vector.shape_cast %21 : vector<2x8x16xf32> to vector<16x16xf32>
    %cst = arith.constant 0.000000e+00 : f32
    %23 = vector.broadcast %cst : f32 to vector<16x128xf32>
    %c0_5 = arith.constant 0 : index
    %c0_6 = arith.constant 0 : index
    %c0_7 = arith.constant 0 : index
    %24 = vector.load %arg0[%c0_5, %c0_6, %c0_7] : memref<2x11x16xf32, #tpu.memory_space<vmem>>, vector<2x8x16xf32>
    %25 = arith.truncf %24 : vector<2x8x16xf32> to vector<2x8x16xbf16>
    %26 = vector.shape_cast %25 : vector<2x8x16xbf16> to vector<16x16xbf16>
    %c0_8 = arith.constant 0 : index
    %c0_9 = arith.constant 0 : index
    %c0_10 = arith.constant 0 : index
    %27 = vector.load %arg1[%c0_8, %c0_9, %c0_10] : memref<4x16x128xbf16, #tpu.memory_space<vmem>>, vector<1x16x128xbf16>
    %28 = vector.shape_cast %27 : vector<1x16x128xbf16> to vector<16x128xbf16>
    %cst_11 = arith.constant dense<0.000000e+00> : vector<16x128xf32>
    %29 = tpu.matmul %26, %28, %cst_11 {dimension_numbers = #tpu.dot_dimension_numbers<[1], [0], [0], [1], [0, 0, 1, 1], [], []>} : vector<16x16xbf16>, vector<16x128xbf16>, vector<16x128xf32> -> vector<16x128xf32>
    %30 = arith.addf %23, %29 : vector<16x128xf32>
    %c0_12 = arith.constant 0 : index
    %c1 = arith.constant 1 : index
    %c0_13 = arith.constant 0 : index
    %31 = vector.load %arg0[%c0_12, %c1, %c0_13] : memref<2x11x16xf32, #tpu.memory_space<vmem>>, vector<2x8x16xf32>
    %32 = arith.truncf %31 : vector<2x8x16xf32> to vector<2x8x16xbf16>
    %33 = vector.shape_cast %32 : vector<2x8x16xbf16> to vector<16x16xbf16>
    %c1_14 = arith.constant 1 : index
    %c0_15 = arith.constant 0 : index
    %c0_16 = arith.constant 0 : index
    %34 = vector.load %arg1[%c1_14, %c0_15, %c0_16] : memref<4x16x128xbf16, #tpu.memory_space<vmem>>, vector<1x16x128xbf16>
    %35 = vector.shape_cast %34 : vector<1x16x128xbf16> to vector<16x128xbf16>
    %cst_17 = arith.constant dense<0.000000e+00> : vector<16x128xf32>
    %36 = tpu.matmul %33, %35, %cst_17 {dimension_numbers = #tpu.dot_dimension_numbers<[1], [0], [0], [1], [0, 0, 1, 1], [], []>} : vector<16x16xbf16>, vector<16x128xbf16>, vector<16x128xf32> -> vector<16x128xf32>
    %37 = arith.addf %30, %36 : vector<16x128xf32>
    %c0_18 = arith.constant 0 : index
    %c2_19 = arith.constant 2 : index
    %c0_20 = arith.constant 0 : index
    %38 = vector.load %arg0[%c0_18, %c2_19, %c0_20] : memref<2x11x16xf32, #tpu.memory_space<vmem>>, vector<2x8x16xf32>
    %39 = arith.truncf %38 : vector<2x8x16xf32> to vector<2x8x16xbf16>
    %40 = vector.shape_cast %39 : vector<2x8x16xbf16> to vector<16x16xbf16>
    %c2_21 = arith.constant 2 : index
    %c0_22 = arith.constant 0 : index
    %c0_23 = arith.constant 0 : index
    %41 = vector.load %arg1[%c2_21, %c0_22, %c0_23] : memref<4x16x128xbf16, #tpu.memory_space<vmem>>, vector<1x16x128xbf16>
    %42 = vector.shape_cast %41 : vector<1x16x128xbf16> to vector<16x128xbf16>
    %cst_24 = arith.constant dense<0.000000e+00> : vector<16x128xf32>
    %43 = tpu.matmul %40, %42, %cst_24 {dimension_numbers = #tpu.dot_dimension_numbers<[1], [0], [0], [1], [0, 0, 1, 1], [], []>} : vector<16x16xbf16>, vector<16x128xbf16>, vector<16x128xf32> -> vector<16x128xf32>
    %44 = arith.addf %37, %43 : vector<16x128xf32>
    %c0_25 = arith.constant 0 : index
    %c3 = arith.constant 3 : index
    %c0_26 = arith.constant 0 : index
    %45 = vector.load %arg0[%c0_25, %c3, %c0_26] : memref<2x11x16xf32, #tpu.memory_space<vmem>>, vector<2x8x16xf32>
    %46 = arith.truncf %45 : vector<2x8x16xf32> to vector<2x8x16xbf16>
    %47 = vector.shape_cast %46 : vector<2x8x16xbf16> to vector<16x16xbf16>
    %c3_27 = arith.constant 3 : index
    %c0_28 = arith.constant 0 : index
    %c0_29 = arith.constant 0 : index
    %48 = vector.load %arg1[%c3_27, %c0_28, %c0_29] : memref<4x16x128xbf16, #tpu.memory_space<vmem>>, vector<1x16x128xbf16>
    %49 = vector.shape_cast %48 : vector<1x16x128xbf16> to vector<16x128xbf16>
    %cst_30 = arith.constant dense<0.000000e+00> : vector<16x128xf32>
    %50 = tpu.matmul %47, %49, %cst_30 {dimension_numbers = #tpu.dot_dimension_numbers<[1], [0], [0], [1], [0, 0, 1, 1], [], []>} : vector<16x16xbf16>, vector<16x128xbf16>, vector<16x128xf32> -> vector<16x128xf32>
    %51 = arith.addf %44, %50 : vector<16x128xf32>
    %c0_31 = arith.constant 0 : index
    %c0_32 = arith.constant 0 : index
    %52 = vector.load %arg2[%c0_31, %c0_32] : memref<1x128xf32, #tpu.memory_space<vmem>>, vector<1x128xf32>
    %53 = vector.broadcast %52 : vector<1x128xf32> to vector<16x128xf32>
    %54 = arith.addf %51, %53 : vector<16x128xf32>
    %cst_33 = arith.constant 0.000000e+00 : f32
    %55 = vector.broadcast %cst_33 : f32 to vector<16x128xf32>
    %56 = arith.maximumf %54, %55 : vector<16x128xf32>
    %c1_i32_34 = arith.constant 1 : i32
    %57 = tpu.dynamic_rotate %56 by %c1_i32_34 dim 0 : vector<16x128xf32>, i32 -> vector<16x128xf32>
    %cst_35 = arith.constant 0.000000e+00 : f32
    %58 = vector.shape_cast %18 : vector<16x1xi1> to vector<16x1xi1>
    %59 = vector.broadcast %58 : vector<16x1xi1> to vector<16x128xi1>
    %60 = vector.broadcast %cst_35 : f32 to vector<16x128xf32>
    %61 = arith.select %59, %57, %60 : vector<16x128xi1>, vector<16x128xf32>
    %62 = arith.maximumf %56, %61 : vector<16x128xf32>
    %63 = arith.truncf %62 : vector<16x128xf32> to vector<16x128xbf16>
    %c0_36 = arith.constant 0 : index
    %c0_37 = arith.constant 0 : index
    %c0_38 = arith.constant 0 : index
    %64 = vector.load %arg3[%c0_36, %c0_37, %c0_38] : memref<3x128x32xbf16, #tpu.memory_space<vmem>>, vector<1x128x32xbf16>
    %65 = vector.shape_cast %64 : vector<1x128x32xbf16> to vector<128x32xbf16>
    %cst_39 = arith.constant dense<0.000000e+00> : vector<16x32xf32>
    %66 = tpu.matmul %63, %65, %cst_39 {dimension_numbers = #tpu.dot_dimension_numbers<[1], [0], [0], [1], [0, 0, 1, 1], [], []>} : vector<16x128xbf16>, vector<128x32xbf16>, vector<16x32xf32> -> vector<16x32xf32>
    %c1_40 = arith.constant 1 : index
    %c0_41 = arith.constant 0 : index
    %c0_42 = arith.constant 0 : index
    %67 = vector.load %arg3[%c1_40, %c0_41, %c0_42] : memref<3x128x32xbf16, #tpu.memory_space<vmem>>, vector<1x128x32xbf16>
    %68 = vector.shape_cast %67 : vector<1x128x32xbf16> to vector<128x32xbf16>
    %cst_43 = arith.constant dense<0.000000e+00> : vector<16x32xf32>
    %69 = tpu.matmul %63, %68, %cst_43 {dimension_numbers = #tpu.dot_dimension_numbers<[1], [0], [0], [1], [0, 0, 1, 1], [], []>} : vector<16x128xbf16>, vector<128x32xbf16>, vector<16x32xf32> -> vector<16x32xf32>
    %c2_44 = arith.constant 2 : index
    %c0_45 = arith.constant 0 : index
    %c0_46 = arith.constant 0 : index
    %70 = vector.load %arg3[%c2_44, %c0_45, %c0_46] : memref<3x128x32xbf16, #tpu.memory_space<vmem>>, vector<1x128x32xbf16>
    %71 = vector.shape_cast %70 : vector<1x128x32xbf16> to vector<128x32xbf16>
    %cst_47 = arith.constant dense<0.000000e+00> : vector<16x32xf32>
    %72 = tpu.matmul %63, %71, %cst_47 {dimension_numbers = #tpu.dot_dimension_numbers<[1], [0], [0], [1], [0, 0, 1, 1], [], []>} : vector<16x128xbf16>, vector<128x32xbf16>, vector<16x32xf32> -> vector<16x32xf32>
    %c1_i32_48 = arith.constant 1 : i32
    %73 = tpu.dynamic_rotate %66 by %c1_i32_48 dim 0 : vector<16x32xf32>, i32 -> vector<16x32xf32>
    %cst_49 = arith.constant 0.000000e+00 : f32
    %74 = vector.shape_cast %18 : vector<16x1xi1> to vector<16x1xi1>
    %75 = vector.broadcast %74 : vector<16x1xi1> to vector<16x32xi1>
    %76 = vector.broadcast %cst_49 : f32 to vector<16x32xf32>
    %77 = arith.select %75, %73, %76 : vector<16x32xi1>, vector<16x32xf32>
    %78 = arith.addf %69, %77 : vector<16x32xf32>
    %c15_i32 = arith.constant 15 : i32
    %79 = tpu.dynamic_rotate %72 by %c15_i32 dim 0 : vector<16x32xf32>, i32 -> vector<16x32xf32>
    %cst_50 = arith.constant 0.000000e+00 : f32
    %80 = vector.shape_cast %20 : vector<16x1xi1> to vector<16x1xi1>
    %81 = vector.broadcast %80 : vector<16x1xi1> to vector<16x32xi1>
    %82 = vector.broadcast %cst_50 : f32 to vector<16x32xf32>
    %83 = arith.select %81, %79, %82 : vector<16x32xi1>, vector<16x32xf32>
    %84 = arith.addf %78, %83 : vector<16x32xf32>
    %c0_51 = arith.constant 0 : index
    %c0_52 = arith.constant 0 : index
    %85 = vector.load %arg4[%c0_51, %c0_52] : memref<1x32xf32, #tpu.memory_space<vmem>>, vector<1x32xf32>
    %86 = vector.broadcast %85 : vector<1x32xf32> to vector<16x32xf32>
    %87 = arith.addf %84, %86 : vector<16x32xf32>
    %cst_53 = arith.constant 0.000000e+00 : f32
    %88 = vector.broadcast %cst_53 : f32 to vector<16x32xf32>
    %89 = arith.maximumf %87, %88 : vector<16x32xf32>
    %90 = arith.truncf %89 : vector<16x32xf32> to vector<16x32xbf16>
    %c0_54 = arith.constant 0 : index
    %c0_55 = arith.constant 0 : index
    %c0_56 = arith.constant 0 : index
    %91 = vector.load %arg5[%c0_54, %c0_55, %c0_56] : memref<3x32x16xbf16, #tpu.memory_space<vmem>>, vector<1x32x16xbf16>
    %92 = vector.shape_cast %91 : vector<1x32x16xbf16> to vector<32x16xbf16>
    %cst_57 = arith.constant dense<0.000000e+00> : vector<16x16xf32>
    %93 = tpu.matmul %90, %92, %cst_57 {dimension_numbers = #tpu.dot_dimension_numbers<[1], [0], [0], [1], [0, 0, 1, 1], [], []>} : vector<16x32xbf16>, vector<32x16xbf16>, vector<16x16xf32> -> vector<16x16xf32>
    %c1_58 = arith.constant 1 : index
    %c0_59 = arith.constant 0 : index
    %c0_60 = arith.constant 0 : index
    %94 = vector.load %arg5[%c1_58, %c0_59, %c0_60] : memref<3x32x16xbf16, #tpu.memory_space<vmem>>, vector<1x32x16xbf16>
    %95 = vector.shape_cast %94 : vector<1x32x16xbf16> to vector<32x16xbf16>
    %cst_61 = arith.constant dense<0.000000e+00> : vector<16x16xf32>
    %96 = tpu.matmul %90, %95, %cst_61 {dimension_numbers = #tpu.dot_dimension_numbers<[1], [0], [0], [1], [0, 0, 1, 1], [], []>} : vector<16x32xbf16>, vector<32x16xbf16>, vector<16x16xf32> -> vector<16x16xf32>
    %c2_62 = arith.constant 2 : index
    %c0_63 = arith.constant 0 : index
    %c0_64 = arith.constant 0 : index
    %97 = vector.load %arg5[%c2_62, %c0_63, %c0_64] : memref<3x32x16xbf16, #tpu.memory_space<vmem>>, vector<1x32x16xbf16>
    %98 = vector.shape_cast %97 : vector<1x32x16xbf16> to vector<32x16xbf16>
    %cst_65 = arith.constant dense<0.000000e+00> : vector<16x16xf32>
    %99 = tpu.matmul %90, %98, %cst_65 {dimension_numbers = #tpu.dot_dimension_numbers<[1], [0], [0], [1], [0, 0, 1, 1], [], []>} : vector<16x32xbf16>, vector<32x16xbf16>, vector<16x16xf32> -> vector<16x16xf32>
    %c1_i32_66 = arith.constant 1 : i32
    %100 = tpu.dynamic_rotate %93 by %c1_i32_66 dim 0 : vector<16x16xf32>, i32 -> vector<16x16xf32>
    %cst_67 = arith.constant 0.000000e+00 : f32
    %101 = vector.shape_cast %18 : vector<16x1xi1> to vector<16x1xi1>
    %102 = vector.broadcast %101 : vector<16x1xi1> to vector<16x16xi1>
    %103 = vector.broadcast %cst_67 : f32 to vector<16x16xf32>
    %104 = arith.select %102, %100, %103 : vector<16x16xi1>, vector<16x16xf32>
    %105 = arith.addf %96, %104 : vector<16x16xf32>
    %c15_i32_68 = arith.constant 15 : i32
    %106 = tpu.dynamic_rotate %99 by %c15_i32_68 dim 0 : vector<16x16xf32>, i32 -> vector<16x16xf32>
    %cst_69 = arith.constant 0.000000e+00 : f32
    %107 = vector.shape_cast %20 : vector<16x1xi1> to vector<16x1xi1>
    %108 = vector.broadcast %107 : vector<16x1xi1> to vector<16x16xi1>
    %109 = vector.broadcast %cst_69 : f32 to vector<16x16xf32>
    %110 = arith.select %108, %106, %109 : vector<16x16xi1>, vector<16x16xf32>
    %111 = arith.addf %105, %110 : vector<16x16xf32>
    %c0_70 = arith.constant 0 : index
    %c0_71 = arith.constant 0 : index
    %112 = vector.load %arg6[%c0_70, %c0_71] : memref<1x16xf32, #tpu.memory_space<vmem>>, vector<1x16xf32>
    %113 = vector.broadcast %112 : vector<1x16xf32> to vector<16x16xf32>
    %114 = arith.addf %111, %113 : vector<16x16xf32>
    %115 = arith.addf %114, %22 : vector<16x16xf32>
    %116 = arith.truncf %115 : vector<16x16xf32> to vector<16x16xbf16>
    %c0_72 = arith.constant 0 : index
    %c0_73 = arith.constant 0 : index
    %117 = vector.load %arg7[%c0_72, %c0_73] : memref<16x32xbf16, #tpu.memory_space<vmem>>, vector<16x32xbf16>
    %cst_74 = arith.constant dense<0.000000e+00> : vector<16x32xf32>
    %118 = tpu.matmul %116, %117, %cst_74 {dimension_numbers = #tpu.dot_dimension_numbers<[1], [0], [0], [1], [0, 0, 1, 1], [], []>} : vector<16x16xbf16>, vector<16x32xbf16>, vector<16x32xf32> -> vector<16x32xf32>
    %119 = arith.truncf %118 : vector<16x32xf32> to vector<16x32xbf16>
    %c0_75 = arith.constant 0 : index
    %c0_76 = arith.constant 0 : index
    %c0_77 = arith.constant 0 : index
    %120 = vector.load %arg8[%c0_75, %c0_76, %c0_77] : memref<4x32x64xbf16, #tpu.memory_space<vmem>>, vector<1x32x64xbf16>
    %121 = vector.shape_cast %120 : vector<1x32x64xbf16> to vector<32x64xbf16>
    %cst_78 = arith.constant dense<0.000000e+00> : vector<16x64xf32>
    %122 = tpu.matmul %119, %121, %cst_78 {dimension_numbers = #tpu.dot_dimension_numbers<[1], [0], [0], [1], [0, 0, 1, 1], [], []>} : vector<16x32xbf16>, vector<32x64xbf16>, vector<16x64xf32> -> vector<16x64xf32>
    %c0_79 = arith.constant 0 : index
    %c0_80 = arith.constant 0 : index
    %c0_81 = arith.constant 0 : index
    %123 = vector.load %arg9[%c0_79, %c0_80, %c0_81] : memref<4x1x64xf32, #tpu.memory_space<vmem>>, vector<1x1x64xf32>
    %124 = vector.shape_cast %123 : vector<1x1x64xf32> to vector<1x64xf32>
    %125 = vector.broadcast %124 : vector<1x64xf32> to vector<16x64xf32>
    %126 = arith.addf %122, %125 : vector<16x64xf32>
    %127 = vector.extract_strided_slice %126 {offsets = [0, 0], sizes = [16, 32], strides = [1, 1]} : vector<16x64xf32> to vector<16x32xf32>
    %cst_82 = arith.constant 0.000000e+00 : f32
    %128 = vector.broadcast %cst_82 : f32 to vector<16x32xf32>
    %129 = arith.maximumf %127, %128 : vector<16x32xf32>
    %130 = vector.extract_strided_slice %126 {offsets = [0, 32], sizes = [16, 32], strides = [1, 1]} : vector<16x64xf32> to vector<16x32xf32>
    %131 = arith.negf %130 : vector<16x32xf32>
    %132 = math.exp %131 : vector<16x32xf32>
    %cst_83 = arith.constant 1.000000e+00 : f32
    %133 = vector.broadcast %cst_83 : f32 to vector<16x32xf32>
    %134 = arith.addf %133, %132 : vector<16x32xf32>
    %135 = arith.divf %133, %134 : vector<16x32xf32>
    %136 = arith.mulf %129, %135 : vector<16x32xf32>
    %cst_84 = arith.constant 1.000000e+00 : f32
    %137 = vector.broadcast %cst_84 : f32 to vector<16x32xf32>
    %138 = arith.subf %137, %135 : vector<16x32xf32>
    %139 = arith.mulf %118, %138 : vector<16x32xf32>
    %140 = arith.addf %136, %139 : vector<16x32xf32>
    %141 = arith.truncf %140 : vector<16x32xf32> to vector<16x32xbf16>
    %c1_85 = arith.constant 1 : index
    %c0_86 = arith.constant 0 : index
    %c0_87 = arith.constant 0 : index
    %142 = vector.load %arg8[%c1_85, %c0_86, %c0_87] : memref<4x32x64xbf16, #tpu.memory_space<vmem>>, vector<1x32x64xbf16>
    %143 = vector.shape_cast %142 : vector<1x32x64xbf16> to vector<32x64xbf16>
    %cst_88 = arith.constant dense<0.000000e+00> : vector<16x64xf32>
    %144 = tpu.matmul %141, %143, %cst_88 {dimension_numbers = #tpu.dot_dimension_numbers<[1], [0], [0], [1], [0, 0, 1, 1], [], []>} : vector<16x32xbf16>, vector<32x64xbf16>, vector<16x64xf32> -> vector<16x64xf32>
    %c1_89 = arith.constant 1 : index
    %c0_90 = arith.constant 0 : index
    %c0_91 = arith.constant 0 : index
    %145 = vector.load %arg9[%c1_89, %c0_90, %c0_91] : memref<4x1x64xf32, #tpu.memory_space<vmem>>, vector<1x1x64xf32>
    %146 = vector.shape_cast %145 : vector<1x1x64xf32> to vector<1x64xf32>
    %147 = vector.broadcast %146 : vector<1x64xf32> to vector<16x64xf32>
    %148 = arith.addf %144, %147 : vector<16x64xf32>
    %149 = vector.extract_strided_slice %148 {offsets = [0, 0], sizes = [16, 32], strides = [1, 1]} : vector<16x64xf32> to vector<16x32xf32>
    %cst_92 = arith.constant 0.000000e+00 : f32
    %150 = vector.broadcast %cst_92 : f32 to vector<16x32xf32>
    %151 = arith.maximumf %149, %150 : vector<16x32xf32>
    %152 = vector.extract_strided_slice %148 {offsets = [0, 32], sizes = [16, 32], strides = [1, 1]} : vector<16x64xf32> to vector<16x32xf32>
    %153 = arith.negf %152 : vector<16x32xf32>
    %154 = math.exp %153 : vector<16x32xf32>
    %cst_93 = arith.constant 1.000000e+00 : f32
    %155 = vector.broadcast %cst_93 : f32 to vector<16x32xf32>
    %156 = arith.addf %155, %154 : vector<16x32xf32>
    %157 = arith.divf %155, %156 : vector<16x32xf32>
    %158 = arith.mulf %151, %157 : vector<16x32xf32>
    %cst_94 = arith.constant 1.000000e+00 : f32
    %159 = vector.broadcast %cst_94 : f32 to vector<16x32xf32>
    %160 = arith.subf %159, %157 : vector<16x32xf32>
    %161 = arith.mulf %140, %160 : vector<16x32xf32>
    %162 = arith.addf %158, %161 : vector<16x32xf32>
    %163 = arith.truncf %162 : vector<16x32xf32> to vector<16x32xbf16>
    %c2_95 = arith.constant 2 : index
    %c0_96 = arith.constant 0 : index
    %c0_97 = arith.constant 0 : index
    %164 = vector.load %arg8[%c2_95, %c0_96, %c0_97] : memref<4x32x64xbf16, #tpu.memory_space<vmem>>, vector<1x32x64xbf16>
    %165 = vector.shape_cast %164 : vector<1x32x64xbf16> to vector<32x64xbf16>
    %cst_98 = arith.constant dense<0.000000e+00> : vector<16x64xf32>
    %166 = tpu.matmul %163, %165, %cst_98 {dimension_numbers = #tpu.dot_dimension_numbers<[1], [0], [0], [1], [0, 0, 1, 1], [], []>} : vector<16x32xbf16>, vector<32x64xbf16>, vector<16x64xf32> -> vector<16x64xf32>
    %c2_99 = arith.constant 2 : index
    %c0_100 = arith.constant 0 : index
    %c0_101 = arith.constant 0 : index
    %167 = vector.load %arg9[%c2_99, %c0_100, %c0_101] : memref<4x1x64xf32, #tpu.memory_space<vmem>>, vector<1x1x64xf32>
    %168 = vector.shape_cast %167 : vector<1x1x64xf32> to vector<1x64xf32>
    %169 = vector.broadcast %168 : vector<1x64xf32> to vector<16x64xf32>
    %170 = arith.addf %166, %169 : vector<16x64xf32>
    %171 = vector.extract_strided_slice %170 {offsets = [0, 0], sizes = [16, 32], strides = [1, 1]} : vector<16x64xf32> to vector<16x32xf32>
    %cst_102 = arith.constant 0.000000e+00 : f32
    %172 = vector.broadcast %cst_102 : f32 to vector<16x32xf32>
    %173 = arith.maximumf %171, %172 : vector<16x32xf32>
    %174 = vector.extract_strided_slice %170 {offsets = [0, 32], sizes = [16, 32], strides = [1, 1]} : vector<16x64xf32> to vector<16x32xf32>
    %175 = arith.negf %174 : vector<16x32xf32>
    %176 = math.exp %175 : vector<16x32xf32>
    %cst_103 = arith.constant 1.000000e+00 : f32
    %177 = vector.broadcast %cst_103 : f32 to vector<16x32xf32>
    %178 = arith.addf %177, %176 : vector<16x32xf32>
    %179 = arith.divf %177, %178 : vector<16x32xf32>
    %180 = arith.mulf %173, %179 : vector<16x32xf32>
    %cst_104 = arith.constant 1.000000e+00 : f32
    %181 = vector.broadcast %cst_104 : f32 to vector<16x32xf32>
    %182 = arith.subf %181, %179 : vector<16x32xf32>
    %183 = arith.mulf %162, %182 : vector<16x32xf32>
    %184 = arith.addf %180, %183 : vector<16x32xf32>
    %185 = arith.truncf %184 : vector<16x32xf32> to vector<16x32xbf16>
    %c3_105 = arith.constant 3 : index
    %c0_106 = arith.constant 0 : index
    %c0_107 = arith.constant 0 : index
    %186 = vector.load %arg8[%c3_105, %c0_106, %c0_107] : memref<4x32x64xbf16, #tpu.memory_space<vmem>>, vector<1x32x64xbf16>
    %187 = vector.shape_cast %186 : vector<1x32x64xbf16> to vector<32x64xbf16>
    %cst_108 = arith.constant dense<0.000000e+00> : vector<16x64xf32>
    %188 = tpu.matmul %185, %187, %cst_108 {dimension_numbers = #tpu.dot_dimension_numbers<[1], [0], [0], [1], [0, 0, 1, 1], [], []>} : vector<16x32xbf16>, vector<32x64xbf16>, vector<16x64xf32> -> vector<16x64xf32>
    %c3_109 = arith.constant 3 : index
    %c0_110 = arith.constant 0 : index
    %c0_111 = arith.constant 0 : index
    %189 = vector.load %arg9[%c3_109, %c0_110, %c0_111] : memref<4x1x64xf32, #tpu.memory_space<vmem>>, vector<1x1x64xf32>
    %190 = vector.shape_cast %189 : vector<1x1x64xf32> to vector<1x64xf32>
    %191 = vector.broadcast %190 : vector<1x64xf32> to vector<16x64xf32>
    %192 = arith.addf %188, %191 : vector<16x64xf32>
    %193 = vector.extract_strided_slice %192 {offsets = [0, 0], sizes = [16, 32], strides = [1, 1]} : vector<16x64xf32> to vector<16x32xf32>
    %cst_112 = arith.constant 0.000000e+00 : f32
    %194 = vector.broadcast %cst_112 : f32 to vector<16x32xf32>
    %195 = arith.maximumf %193, %194 : vector<16x32xf32>
    %196 = vector.extract_strided_slice %192 {offsets = [0, 32], sizes = [16, 32], strides = [1, 1]} : vector<16x64xf32> to vector<16x32xf32>
    %197 = arith.negf %196 : vector<16x32xf32>
    %198 = math.exp %197 : vector<16x32xf32>
    %cst_113 = arith.constant 1.000000e+00 : f32
    %199 = vector.broadcast %cst_113 : f32 to vector<16x32xf32>
    %200 = arith.addf %199, %198 : vector<16x32xf32>
    %201 = arith.divf %199, %200 : vector<16x32xf32>
    %202 = arith.mulf %195, %201 : vector<16x32xf32>
    %cst_114 = arith.constant 1.000000e+00 : f32
    %203 = vector.broadcast %cst_114 : f32 to vector<16x32xf32>
    %204 = arith.subf %203, %201 : vector<16x32xf32>
    %205 = arith.mulf %184, %204 : vector<16x32xf32>
    %206 = arith.addf %202, %205 : vector<16x32xf32>
    %207 = arith.truncf %206 : vector<16x32xf32> to vector<16x32xbf16>
    %c0_115 = arith.constant 0 : index
    %c0_116 = arith.constant 0 : index
    %208 = vector.load %arg10[%c0_115, %c0_116] : memref<32x96xbf16, #tpu.memory_space<vmem>>, vector<32x96xbf16>
    %cst_117 = arith.constant dense<0.000000e+00> : vector<16x96xf32>
    %209 = tpu.matmul %207, %208, %cst_117 {dimension_numbers = #tpu.dot_dimension_numbers<[1], [0], [0], [1], [0, 0, 1, 1], [], []>} : vector<16x32xbf16>, vector<32x96xbf16>, vector<16x96xf32> -> vector<16x96xf32>
    %c0_118 = arith.constant 0 : index
    %c0_119 = arith.constant 0 : index
    %210 = vector.load %arg12[%c0_118, %c0_119] : memref<1x96xf32, #tpu.memory_space<vmem>>, vector<1x96xf32>
    %211 = vector.broadcast %210 : vector<1x96xf32> to vector<16x96xf32>
    %212 = arith.addf %209, %211 : vector<16x96xf32>
    %213 = vector.shape_cast %212 : vector<16x96xf32> to vector<2x8x96xf32>
    %c0_120 = arith.constant 0 : index
    %c0_121 = arith.constant 0 : index
    %c0_122 = arith.constant 0 : index
    %214 = vector.load %arg22[%c0_120, %c0_121, %c0_122] : memref<2x8x96xf32, #tpu.memory_space<vmem>>, vector<2x8x96xf32>
    tpu.vector_store %arg22[%c0_120, %c0_121, %c0_122], %213 {strides = array<i32>} : memref<2x8x96xf32, #tpu.memory_space<vmem>>, vector<2x8x96xf32>,
    %c0_123 = arith.constant 0 : index
    %c0_124 = arith.constant 0 : index
    %215 = vector.load %arg14[%c0_123, %c0_124] : memref<32x96xbf16, #tpu.memory_space<vmem>>, vector<32x96xbf16>
    %cst_125 = arith.constant dense<0.000000e+00> : vector<16x96xf32>
    %216 = tpu.matmul %207, %215, %cst_125 {dimension_numbers = #tpu.dot_dimension_numbers<[1], [0], [0], [1], [0, 0, 1, 1], [], []>} : vector<16x32xbf16>, vector<32x96xbf16>, vector<16x96xf32> -> vector<16x96xf32>
    %c0_126 = arith.constant 0 : index
    %c0_127 = arith.constant 0 : index
    %217 = vector.load %arg16[%c0_126, %c0_127] : memref<1x96xf32, #tpu.memory_space<vmem>>, vector<1x96xf32>
    %218 = vector.broadcast %217 : vector<1x96xf32> to vector<16x96xf32>
    %219 = arith.addf %216, %218 : vector<16x96xf32>
    %220 = vector.shape_cast %219 : vector<16x96xf32> to vector<2x8x96xf32>
    %c0_128 = arith.constant 0 : index
    %c0_129 = arith.constant 0 : index
    %c0_130 = arith.constant 0 : index
    %221 = vector.load %arg23[%c0_128, %c0_129, %c0_130] : memref<2x8x96xf32, #tpu.memory_space<vmem>>, vector<2x8x96xf32>
    tpu.vector_store %arg23[%c0_128, %c0_129, %c0_130], %220 {strides = array<i32>} : memref<2x8x96xf32, #tpu.memory_space<vmem>>, vector<2x8x96xf32>,
    %c0_131 = arith.constant 0 : index
    %c0_132 = arith.constant 0 : index
    %222 = vector.load %arg11[%c0_131, %c0_132] : memref<32x96xbf16, #tpu.memory_space<vmem>>, vector<32x96xbf16>
    %c0_133 = arith.constant 0 : index
    %c0_134 = arith.constant 0 : index
    %223 = vector.load %arg13[%c0_133, %c0_134] : memref<1x96xf32, #tpu.memory_space<vmem>>, vector<1x96xf32>
    %c0_135 = arith.constant 0 : index
    %c0_136 = arith.constant 0 : index
    %224 = vector.load %arg15[%c0_135, %c0_136] : memref<32x96xbf16, #tpu.memory_space<vmem>>, vector<32x96xbf16>
    %c0_137 = arith.constant 0 : index
    %c0_138 = arith.constant 0 : index
    %225 = vector.load %arg17[%c0_137, %c0_138] : memref<1x96xf32, #tpu.memory_space<vmem>>, vector<1x96xf32>
    %cst_139 = arith.constant 0.000000e+00 : f32
    %226 = vector.broadcast %cst_139 : f32 to vector<2x32xf32>
    %c0_140 = arith.constant 0 : index
    %c0_141 = arith.constant 0 : index
    %227 = vector.load %arg24[%c0_140, %c0_141] : memref<2x32xf32, #tpu.memory_space<vmem>>, vector<2x32xf32>
    tpu.vector_store %arg24[%c0_140, %c0_141], %226 {strides = array<i32>} : memref<2x32xf32, #tpu.memory_space<vmem>>, vector<2x32xf32>,
    %cst_142 = arith.constant 0.000000e+00 : f32
    %228 = vector.broadcast %cst_142 : f32 to vector<2x32xf32>
    %c0_143 = arith.constant 0 : index
    %c0_144 = arith.constant 0 : index
    %229 = vector.load %arg25[%c0_143, %c0_144] : memref<2x32xf32, #tpu.memory_space<vmem>>, vector<2x32xf32>
    tpu.vector_store %arg25[%c0_143, %c0_144], %228 {strides = array<i32>} : memref<2x32xf32, #tpu.memory_space<vmem>>, vector<2x32xf32>,
    %c0_i32_145 = arith.constant 0 : i32
    %c8_i32_146 = arith.constant 8 : i32
    %230 = arith.addi %c0_i32_145, %c8_i32_146 : i32
    %c1_i32_147 = arith.constant 1 : i32
    scf.for %arg28 = %c0_i32_145 to %230 step %c1_i32_147  : i32 {
      %c1_i32_166 = arith.constant 1 : i32
      %247 = arith.muli %arg28, %c1_i32_166 : i32
      %c0_i32_167 = arith.constant 0 : i32
      %248 = arith.addi %c0_i32_167, %247 : i32
      %c0_168 = arith.constant 0 : index
      %249 = arith.index_cast %248 : i32 to index
      %c0_169 = arith.constant 0 : index
      %250 = vector.load %arg22[%c0_168, %249, %c0_169] : memref<2x8x96xf32, #tpu.memory_space<vmem>>, vector<2x1x96xf32>
      %251 = vector.shape_cast %250 : vector<2x1x96xf32> to vector<2x96xf32>
      %c0_170 = arith.constant 0 : index
      %c0_171 = arith.constant 0 : index
      %252 = vector.load %arg24[%c0_170, %c0_171] : memref<2x32xf32, #tpu.memory_space<vmem>>, vector<2x32xf32>
      %253 = arith.truncf %252 : vector<2x32xf32> to vector<2x32xbf16>
      %cst_172 = arith.constant dense<0.000000e+00> : vector<2x96xf32>
      %254 = tpu.matmul %253, %222, %cst_172 {dimension_numbers = #tpu.dot_dimension_numbers<[1], [0], [0], [1], [0, 0, 1, 1], [], []>} : vector<2x32xbf16>, vector<32x96xbf16>, vector<2x96xf32> -> vector<2x96xf32>
      %255 = vector.broadcast %223 : vector<1x96xf32> to vector<2x96xf32>
      %256 = arith.addf %254, %255 : vector<2x96xf32>
      %257 = vector.extract_strided_slice %251 {offsets = [0, 0], sizes = [2, 32], strides = [1, 1]} : vector<2x96xf32> to vector<2x32xf32>
      %258 = vector.extract_strided_slice %256 {offsets = [0, 0], sizes = [2, 32], strides = [1, 1]} : vector<2x96xf32> to vector<2x32xf32>
      %259 = arith.addf %257, %258 : vector<2x32xf32>
      %260 = arith.negf %259 : vector<2x32xf32>
      %261 = math.exp %260 : vector<2x32xf32>
      %cst_173 = arith.constant 1.000000e+00 : f32
      %262 = vector.broadcast %cst_173 : f32 to vector<2x32xf32>
      %263 = arith.addf %262, %261 : vector<2x32xf32>
      %264 = arith.divf %262, %263 : vector<2x32xf32>
      %265 = vector.extract_strided_slice %251 {offsets = [0, 32], sizes = [2, 32], strides = [1, 1]} : vector<2x96xf32> to vector<2x32xf32>
      %266 = vector.extract_strided_slice %256 {offsets = [0, 32], sizes = [2, 32], strides = [1, 1]} : vector<2x96xf32> to vector<2x32xf32>
      %267 = arith.addf %265, %266 : vector<2x32xf32>
      %268 = arith.negf %267 : vector<2x32xf32>
      %269 = math.exp %268 : vector<2x32xf32>
      %cst_174 = arith.constant 1.000000e+00 : f32
      %270 = vector.broadcast %cst_174 : f32 to vector<2x32xf32>
      %271 = arith.addf %270, %269 : vector<2x32xf32>
      %272 = arith.divf %270, %271 : vector<2x32xf32>
      %273 = vector.extract_strided_slice %251 {offsets = [0, 64], sizes = [2, 32], strides = [1, 1]} : vector<2x96xf32> to vector<2x32xf32>
      %274 = vector.extract_strided_slice %256 {offsets = [0, 64], sizes = [2, 32], strides = [1, 1]} : vector<2x96xf32> to vector<2x32xf32>
      %275 = arith.mulf %264, %274 : vector<2x32xf32>
      %276 = arith.addf %273, %275 : vector<2x32xf32>
      %277 = math.tanh %276 : vector<2x32xf32>
      %cst_175 = arith.constant 1.000000e+00 : f32
      %278 = vector.broadcast %cst_175 : f32 to vector<2x32xf32>
      %279 = arith.subf %278, %272 : vector<2x32xf32>
      %280 = arith.mulf %279, %277 : vector<2x32xf32>
      %281 = arith.mulf %272, %252 : vector<2x32xf32>
      %282 = arith.addf %280, %281 : vector<2x32xf32>
      %c0_176 = arith.constant 0 : index
      %c0_177 = arith.constant 0 : index
      %283 = vector.load %arg24[%c0_176, %c0_177] : memref<2x32xf32, #tpu.memory_space<vmem>>, vector<2x32xf32>
      tpu.vector_store %arg24[%c0_176, %c0_177], %282 {strides = array<i32>} : memref<2x32xf32, #tpu.memory_space<vmem>>, vector<2x32xf32>,
      %284 = vector.shape_cast %282 : vector<2x32xf32> to vector<2x1x32xf32>
      %c0_178 = arith.constant 0 : index
      %285 = arith.index_cast %248 : i32 to index
      %c0_179 = arith.constant 0 : index
      %286 = vector.load %arg26[%c0_178, %285, %c0_179] : memref<2x8x32xf32, #tpu.memory_space<vmem>>, vector<2x1x32xf32>
      tpu.vector_store %arg26[%c0_178, %285, %c0_179], %284 {strides = array<i32>} : memref<2x8x32xf32, #tpu.memory_space<vmem>>, vector<2x1x32xf32>,
      %c7_i32_180 = arith.constant 7 : i32
      %287 = arith.subi %c7_i32_180, %248 : i32
      %c0_181 = arith.constant 0 : index
      %288 = arith.index_cast %287 : i32 to index
      %c0_182 = arith.constant 0 : index
      %289 = vector.load %arg23[%c0_181, %288, %c0_182] : memref<2x8x96xf32, #tpu.memory_space<vmem>>, vector<2x1x96xf32>
      %290 = vector.shape_cast %289 : vector<2x1x96xf32> to vector<2x96xf32>
      %c0_183 = arith.constant 0 : index
      %c0_184 = arith.constant 0 : index
      %291 = vector.load %arg25[%c0_183, %c0_184] : memref<2x32xf32, #tpu.memory_space<vmem>>, vector<2x32xf32>
      %292 = arith.truncf %291 : vector<2x32xf32> to vector<2x32xbf16>
      %cst_185 = arith.constant dense<0.000000e+00> : vector<2x96xf32>
      %293 = tpu.matmul %292, %224, %cst_185 {dimension_numbers = #tpu.dot_dimension_numbers<[1], [0], [0], [1], [0, 0, 1, 1], [], []>} : vector<2x32xbf16>, vector<32x96xbf16>, vector<2x96xf32> -> vector<2x96xf32>
      %294 = vector.broadcast %225 : vector<1x96xf32> to vector<2x96xf32>
      %295 = arith.addf %293, %294 : vector<2x96xf32>
      %296 = vector.extract_strided_slice %290 {offsets = [0, 0], sizes = [2, 32], strides = [1, 1]} : vector<2x96xf32> to vector<2x32xf32>
      %297 = vector.extract_strided_slice %295 {offsets = [0, 0], sizes = [2, 32], strides = [1, 1]} : vector<2x96xf32> to vector<2x32xf32>
      %298 = arith.addf %296, %297 : vector<2x32xf32>
      %299 = arith.negf %298 : vector<2x32xf32>
      %300 = math.exp %299 : vector<2x32xf32>
      %cst_186 = arith.constant 1.000000e+00 : f32
      %301 = vector.broadcast %cst_186 : f32 to vector<2x32xf32>
      %302 = arith.addf %301, %300 : vector<2x32xf32>
      %303 = arith.divf %301, %302 : vector<2x32xf32>
      %304 = vector.extract_strided_slice %290 {offsets = [0, 32], sizes = [2, 32], strides = [1, 1]} : vector<2x96xf32> to vector<2x32xf32>
      %305 = vector.extract_strided_slice %295 {offsets = [0, 32], sizes = [2, 32], strides = [1, 1]} : vector<2x96xf32> to vector<2x32xf32>
      %306 = arith.addf %304, %305 : vector<2x32xf32>
      %307 = arith.negf %306 : vector<2x32xf32>
      %308 = math.exp %307 : vector<2x32xf32>
      %cst_187 = arith.constant 1.000000e+00 : f32
      %309 = vector.broadcast %cst_187 : f32 to vector<2x32xf32>
      %310 = arith.addf %309, %308 : vector<2x32xf32>
      %311 = arith.divf %309, %310 : vector<2x32xf32>
      %312 = vector.extract_strided_slice %290 {offsets = [0, 64], sizes = [2, 32], strides = [1, 1]} : vector<2x96xf32> to vector<2x32xf32>
      %313 = vector.extract_strided_slice %295 {offsets = [0, 64], sizes = [2, 32], strides = [1, 1]} : vector<2x96xf32> to vector<2x32xf32>
      %314 = arith.mulf %303, %313 : vector<2x32xf32>
      %315 = arith.addf %312, %314 : vector<2x32xf32>
      %316 = math.tanh %315 : vector<2x32xf32>
      %cst_188 = arith.constant 1.000000e+00 : f32
      %317 = vector.broadcast %cst_188 : f32 to vector<2x32xf32>
      %318 = arith.subf %317, %311 : vector<2x32xf32>
      %319 = arith.mulf %318, %316 : vector<2x32xf32>
      %320 = arith.mulf %311, %291 : vector<2x32xf32>
      %321 = arith.addf %319, %320 : vector<2x32xf32>
      %c0_189 = arith.constant 0 : index
      %c0_190 = arith.constant 0 : index
      %322 = vector.load %arg25[%c0_189, %c0_190] : memref<2x32xf32, #tpu.memory_space<vmem>>, vector<2x32xf32>
      tpu.vector_store %arg25[%c0_189, %c0_190], %321 {strides = array<i32>} : memref<2x32xf32, #tpu.memory_space<vmem>>, vector<2x32xf32>,
      %323 = vector.shape_cast %321 : vector<2x32xf32> to vector<2x1x32xf32>
      %c0_191 = arith.constant 0 : index
      %324 = arith.index_cast %287 : i32 to index
      %c0_192 = arith.constant 0 : index
      %325 = vector.load %arg27[%c0_191, %324, %c0_192] : memref<2x8x32xf32, #tpu.memory_space<vmem>>, vector<2x1x32xf32>
      tpu.vector_store %arg27[%c0_191, %324, %c0_192], %323 {strides = array<i32>} : memref<2x8x32xf32, #tpu.memory_space<vmem>>, vector<2x1x32xf32>,
    }
    %c8_i32_148 = arith.constant 8 : i32
    %c0_149 = arith.constant 0 : index
    %c0_150 = arith.constant 0 : index
    %c0_151 = arith.constant 0 : index
    %231 = vector.load %arg26[%c0_149, %c0_150, %c0_151] : memref<2x8x32xf32, #tpu.memory_space<vmem>>, vector<2x8x32xf32>
    %232 = vector.shape_cast %231 : vector<2x8x32xf32> to vector<16x32xf32>
    %233 = arith.truncf %232 : vector<16x32xf32> to vector<16x32xbf16>
    %c0_152 = arith.constant 0 : index
    %c0_153 = arith.constant 0 : index
    %234 = vector.load %arg18[%c0_152, %c0_153] : memref<32x24xbf16, #tpu.memory_space<vmem>>, vector<32x24xbf16>
    %cst_154 = arith.constant dense<0.000000e+00> : vector<16x24xf32>
    %235 = tpu.matmul %233, %234, %cst_154 {dimension_numbers = #tpu.dot_dimension_numbers<[1], [0], [0], [1], [0, 0, 1, 1], [], []>} : vector<16x32xbf16>, vector<32x24xbf16>, vector<16x24xf32> -> vector<16x24xf32>
    %c0_155 = arith.constant 0 : index
    %c0_156 = arith.constant 0 : index
    %c0_157 = arith.constant 0 : index
    %236 = vector.load %arg27[%c0_155, %c0_156, %c0_157] : memref<2x8x32xf32, #tpu.memory_space<vmem>>, vector<2x8x32xf32>
    %237 = vector.shape_cast %236 : vector<2x8x32xf32> to vector<16x32xf32>
    %238 = arith.truncf %237 : vector<16x32xf32> to vector<16x32xbf16>
    %c0_158 = arith.constant 0 : index
    %c0_159 = arith.constant 0 : index
    %239 = vector.load %arg19[%c0_158, %c0_159] : memref<32x24xbf16, #tpu.memory_space<vmem>>, vector<32x24xbf16>
    %cst_160 = arith.constant dense<0.000000e+00> : vector<16x24xf32>
    %240 = tpu.matmul %238, %239, %cst_160 {dimension_numbers = #tpu.dot_dimension_numbers<[1], [0], [0], [1], [0, 0, 1, 1], [], []>} : vector<16x32xbf16>, vector<32x24xbf16>, vector<16x24xf32> -> vector<16x24xf32>
    %241 = arith.addf %235, %240 : vector<16x24xf32>
    %c0_161 = arith.constant 0 : index
    %c0_162 = arith.constant 0 : index
    %242 = vector.load %arg20[%c0_161, %c0_162] : memref<1x24xf32, #tpu.memory_space<vmem>>, vector<1x24xf32>
    %243 = vector.broadcast %242 : vector<1x24xf32> to vector<16x24xf32>
    %244 = arith.addf %241, %243 : vector<16x24xf32>
    %245 = vector.shape_cast %244 : vector<16x24xf32> to vector<2x8x24xf32>
    %c0_163 = arith.constant 0 : index
    %c0_164 = arith.constant 0 : index
    %c0_165 = arith.constant 0 : index
    %246 = vector.load %arg21[%c0_163, %c0_164, %c0_165] : memref<2x8x24xf32, #tpu.memory_space<vmem>>, vector<2x8x24xf32>
    tpu.vector_store %arg21[%c0_163, %c0_164, %c0_165], %245 {strides = array<i32>} : memref<2x8x24xf32, #tpu.memory_space<vmem>>, vector<2x8x24xf32>,
    return
  }
}

</mosaic_0001>

<bundles_post_ra>
// kernel: tpu_custom_call.1
= control target key start
LH: loop header
LB: loop body
LE: loop exit
PB: predicated region body
PF: predicated region fallthrough
CT: control target
= control target key end

     0   :  { %s3274_s0 = inlined_call_operand.vmem [shape: f32[2,11,16], index: 0, kind: input, shape index: {}]   ;;  %s3275_s1 = inlined_call_operand.vmem [shape: bf16[4,16,128], index: 1, kind: input, shape index: {}]   ;;  %s3276_s2 = inlined_call_operand.vmem [shape: f32[1,128], index: 2, kind: input, shape index: {}]   ;;  %s3277_s3 = inlined_call_operand.vmem [shape: bf16[3,128,32], index: 3, kind: input, shape index: {}]   ;;  %s3278_s4 = inlined_call_operand.vmem [shape: f32[1,32], index: 4, kind: input, shape index: {}]   ;;  %s3279_s5 = inlined_call_operand.vmem [shape: bf16[3,32,16], index: 5, kind: input, shape index: {}]   ;;  %s3280_s6 = inlined_call_operand.vmem [shape: f32[1,16], index: 6, kind: input, shape index: {}]   ;;  %s3281_s7 = inlined_call_operand.vmem [shape: bf16[16,32], index: 7, kind: input, shape index: {}]   ;;  %s3282_s8 = inlined_call_operand.vmem [shape: bf16[4,32,64], index: 8, kind: input, shape index: {}]   ;;  %s3283_s9 = inlined_call_operand.vmem [shape: f32[4,1,64], index: 9, kind: input, shape index: {}]   ;;  %s3284_s10 = inlined_call_operand.vmem [shape: bf16[32,96], index: 10, kind: input, shape index: {}]   ;;  %s3285_s11 = inlined_call_operand.vmem [shape: bf16[32,96], index: 11, kind: input, shape index: {}]   ;;  %s3286_s12 = inlined_call_operand.vmem [shape: f32[1,96], index: 12, kind: input, shape index: {}]   ;;  %s3287_s13 = inlined_call_operand.vmem [shape: f32[1,96], index: 13, kind: input, shape index: {}]   ;;  %s3288_s14 = inlined_call_operand.vmem [shape: bf16[32,96], index: 14, kind: input, shape index: {}]   ;;  %s3289_s15 = inlined_call_operand.vmem [shape: bf16[32,96], index: 15, kind: input, shape index: {}]   ;;  %s3290_s16 = inlined_call_operand.vmem [shape: f32[1,96], index: 16, kind: input, shape index: {}]   ;;  %s3291_s17 = inlined_call_operand.vmem [shape: f32[1,96], index: 17, kind: input, shape index: {}]   ;;  %s3292_s18 = inlined_call_operand.vmem [shape: bf16[32,24], index: 18, kind: input, shape index: {}]   ;;  %s3293_s19 = inlined_call_operand.vmem [shape: bf16[32,24], index: 19, kind: input, shape index: {}]   ;;  %s3294_s20 = inlined_call_operand.vmem [shape: f32[1,24], index: 20, kind: input, shape index: {}]   ;;  %s3295_s21 = inlined_call_operand.hbm [shape: f32[2,8,24], index: 21, kind: output, shape index: {}]  }
   0x1   :  { %3300 = sst [smem:[#allocation11_spill]] %s3274_s0 }
   0x2   :  { %3301 = sst [smem:[#allocation12_spill]] %s3275_s1 }
   0x3   :  { %3302 = sst [smem:[#allocation13_spill]] %s3276_s2 }
   0x4   :  { %3303 = sst [smem:[#allocation14_spill]] %s3277_s3 }
   0x5   :  { %3304 = sst [smem:[#allocation15_spill]] %s3278_s4 }
   0x6   :  { %3305 = sst [smem:[#allocation16_spill]] %s3279_s5 }
   0x7   :  { %26 = vsyncpa [#allocation9], 0  ;;  %s3306_s26 = sld [smem:[#allocation12_spill]]  ;;  %v2617_v1 = vmov 0.0   ;;  %s3307_s0 = sld [smem:[#allocation11_spill]]  ;;  %vm127_vm0 = vcmask 130048   ;;  %v70_v40 = vlaneseq }
   0x8   :  { %2265 = vmatprep.subr.bf16.mxu0 %v2617_v1  ;;  %2271 = vmatprep.subr.bf16.mxu1 %v2617_v1  ;;  %vm2618_vm1 = vmmov 0   ;;  %s3308_s24 = sld [smem:[#allocation14_spill]]  ;;  %s3314_s5 = sld [smem:[#allocation16_spill]]  ;;  %vm742_vm8 = vcmask 261120   ;;  %vm1558_vm9 = vcmask 254976   ;;  %vm1479_vm10 = vcmask 785408  }
   0x9   :  { %2267 = vmatprep.mubr.msk.bf16.mxu0 %vm2618_vm1, %v2617_v1  ;;  %2273 = vmatprep.mubr.msk.bf16.mxu1 %vm2618_vm1, %v2617_v1  ;;  %v2866_v44 = vshrl.u32 %v70_v40, 7  ;;  %s3319_s1 = sld [smem:[#allocation15_spill]]  ;;  %s2619_s28 = smov 96   ;;  %1559 = vst.msk [vmem:[#allocation4] sm:$0x3] %vm1558_vm9, %v2617_v1 }
   0xa   :  { %1560 = vst.msk [vmem:[#allocation5] sm:$0x3] %vm1558_vm9, %v2617_v1 }
   0xb   :  { %v2872_v54 = vadd.s32 8, %v2866_v44  ;;  %v77_v61 = vand.u32 7, %v2866_v44  ;;  %vm366_vm2 = vcmp.lt.s32.totalorder %v2866_v44, 1  ;;  %vm703_vm5 = vcmp.lt.s32.totalorder %v2866_v44, 7 }
   0xd   :  { %v2478_v0 = vld [vmem:[%s3306_s26 + $0x8] sm:$0xff]   ;;  %v2479_v2 = vld [vmem:[%s3306_s26] sm:$0xff]   ;;  %v110_v4 = vld [vmem:[%s3307_s0 + $0x11] sm:$0xff]  ;;  %v84_v62 = vand.u32 7, %v2872_v54  ;;  %vm2879_vm3 = vcmp.ge.s32.totalorder %v77_v61, 1  ;;  %vm2954_vm6 = vcmp.lt.s32.totalorder %v77_v61, 7 }
   0xe   :  { %2266 = vmatpush3.bf16.msra.mxu0 %v2478_v0  ;;  %v109_v3 = vld [vmem:[%s3307_s0 + $0x1] sm:$0xff]  ;;  %v104_v7 = vld [vmem:[%s3307_s0 + $0x10] sm:$0xff]  ;;  %2272 = vmatpush3.bf16.msra.mxu1 %v2479_v2  ;;  %v2481_v10 = vld [vmem:[%s3306_s26 + $0x18] sm:$0xff]  }
   0xf   :  { %v2185_v5 = vpack.c.bf16 %v110_v4, %v109_v3  ;;  %v103_v6 = vld [vmem:[%s3307_s0] sm:$0xff]  ;;  %2277 = vmatprep.subr.bf16.mxu0 %v2617_v1  ;;  %v2480_v9 = vld [vmem:[%s3306_s26 + $0x10] sm:$0xff]   ;;  %2283 = vmatprep.subr.bf16.mxu1 %v2617_v1  ;;  %v2484_v19 = vld [vmem:[%s3308_s24 + $0x8] sm:$0xff]   ;;  %vm2885_vm4 = vcmp.ge.s32.totalorder %v84_v62, 1  ;;  %vm2962_vm7 = vcmp.lt.s32.totalorder %v84_v62, 7 }
  0x10   :  { %v2186_v8 = vpack.c.bf16 %v104_v7, %v103_v6  ;;  %v2776_v11 = vld [vmem:[%s3307_s0 + $0x2] sm:$0xff]  ;;  %v2781_v12 = vld [vmem:[%s3307_s0 + $0x12] sm:$0xff] }
  0x11   :  { %2268 = vmatmul.mubr.msk.bf16.vlgmr.msra.gmra.mrb[0].mxu0 %vm127_vm0, %v2185_v5  ;;  %v289_v13 = vld [vmem:[%s3307_s0 + $0x3] sm:$0xff]  ;;  %v290_v14 = vld [vmem:[%s3307_s0 + $0x13] sm:$0xff]  ;;  %v2187_v15 = vpack.c.bf16 %v2781_v12, %v2776_v11  ;;  %s3309_s0 = sld [smem:[#allocation13_spill]] }
  0x12   :  { %2278 = vmatpush3.bf16.msra.mxu0 %v2480_v9  ;;  %2279 = vmatprep.mubr.msk.bf16.mxu0 %vm2618_vm1, %v2617_v1  ;;  %v2482_v16 = vld [vmem:[%s3308_s24] sm:$0xff]   ;;  %v2188_v18 = vpack.c.bf16 %v290_v14, %v289_v13  ;;  %v2485_v20 = vld [vmem:[%s3308_s24 + $0x88] sm:$0xff]   ;;  %v2486_v21 = vld [vmem:[%s3308_s24 + $0x10] sm:$0xff]  }
  0x13   :  { %2274 = vmatmul.mubr.msk.bf16.vlgmr.msra.gmra.mrb[0].mxu1 %vm127_vm0, %v2186_v8  ;;  %2289 = vmatprep.subr.bf16.mxu0 %v2617_v1  ;;  %v2483_v17 = vld [vmem:[%s3308_s24 + $0x80] sm:$0xff]   ;;  %v2487_v22 = vld [vmem:[%s3308_s24 + $0x90] sm:$0xff]   ;;  %v2488_v23 = vld [vmem:[%s3308_s24 + $0x18] sm:$0xff]  }
  0x14   :  { %2284 = vmatpush3.bf16.msra.mxu1 %v2481_v10  ;;  %2285 = vmatprep.mubr.msk.bf16.mxu1 %vm2618_vm1, %v2617_v1  ;;  %v2489_v24 = vld [vmem:[%s3308_s24 + $0x98] sm:$0xff]   ;;  %v2490_v25 = vld [vmem:[%s3308_s24 + $0x20] sm:$0xff]   ;;  %v2492_v27 = vld [vmem:[%s3308_s24 + $0x28] sm:$0xff]  }
  0x15   :  { %2309 = vmatprep.subr.bf16.mxu1 %v2617_v1  ;;  %v2491_v26 = vld [vmem:[%s3308_s24 + $0xa0] sm:$0xff]   ;;  %v2493_v28 = vld [vmem:[%s3308_s24 + $0xa8] sm:$0xff]   ;;  %v2494_v29 = vld [vmem:[%s3308_s24 + $0x30] sm:$0xff]  }
  0x16   :  { %v2495_v30 = vld [vmem:[%s3308_s24 + $0xb0] sm:$0xff]   ;;  %v2496_v31 = vld [vmem:[%s3308_s24 + $0x38] sm:$0xff]   ;;  %v2498_v14 = vld [vmem:[%s3308_s24 + $0x40] sm:$0xff]  }
  0x17   :  { %v2497_v32 = vld [vmem:[%s3308_s24 + $0xb8] sm:$0xff]   ;;  %v2041_v49 = vld [vmem:[%s3309_s0] ss:$0 sm:$0xff]  ;;  %v2514_v4 = vld [vmem:[%s3282_s8 + $0x8] sm:$0xff]  }
  0x18   :  { %v2508_v61 = vld [vmem:[%s3314_s5 + $0x20] sm:$0xff]  }
  0x19   :  { %2280 = vmatmul.mubr.msk.bf16.vlgmr.msra.gmra.mrb[4].mxu0 %vm127_vm0, %v2187_v15 }
  0x1a   :  { %2290 = vmatpush3.bf16.msra.mxu0 %v2482_v16  ;;  %2305 = vmatprep.mubr.msk.bf16.mxu0 %vm2618_vm1, %v2617_v1  ;;  %v2499_v16 = vld [vmem:[%s3308_s24 + $0x48] sm:$0xff]  }
  0x1b   :  { %2286 = vmatmul.mubr.msk.bf16.vlgmr.msra.gmra.mrb[4].mxu1 %vm127_vm0, %v2188_v18  ;;  %2291 = vmatprep.subr.bf16.mxu0 %v2617_v1  ;;  %v2501_v18 = vld [vmem:[%s3308_s24 + $0x58] sm:$0xff]  }
  0x1c   :  { %2310 = vmatpush3.bf16.msra.mxu1 %v2483_v17  ;;  %2325 = vmatprep.mubr.msk.bf16.mxu1 %vm2618_vm1, %v2617_v1  ;;  %v2500_v17 = vld [vmem:[%s3308_s24 + $0x50] sm:$0xff]  }
  0x1d   :  { %2311 = vmatprep.subr.bf16.mxu1 %v2617_v1 }
  0x1e   :  { %2292 = vmatpush3.bf16.msra.mxu0 %v2484_v19  ;;  %v2502_v19 = vld [vmem:[%s3308_s24 + $0x60] sm:$0xff]  }
  0x1f   :  { %2293 = vmatprep.subr.bf16.mxu0 %v2617_v1 }
  0x20   :  { %2312 = vmatpush3.bf16.msra.mxu1 %v2485_v20  ;;  %v2503_v20 = vld [vmem:[%s3308_s24 + $0x68] sm:$0xff]  }
  0x21   :  { %2313 = vmatprep.subr.bf16.mxu1 %v2617_v1 }
  0x22   :  { %2294 = vmatpush3.bf16.msra.mxu0 %v2486_v21  ;;  %v2504_v21 = vld [vmem:[%s3308_s24 + $0x70] sm:$0xff]  }
  0x23   :  { %2295 = vmatprep.subr.bf16.mxu0 %v2617_v1 }
  0x24   :  { %2314 = vmatpush3.bf16.msra.mxu1 %v2487_v22  ;;  %v2505_v22 = vld [vmem:[%s3308_s24 + $0x78] sm:$0xff]  }
  0x25   :  { %2315 = vmatprep.subr.bf16.mxu1 %v2617_v1 }
  0x26   :  { %2296 = vmatpush3.bf16.msra.mxu0 %v2488_v23  ;;  %v2506_v23 = vld [vmem:[%s3314_s5] sm:$0xff]  }
  0x27   :  { %2297 = vmatprep.subr.bf16.mxu0 %v2617_v1 }
  0x28   :  { %2316 = vmatpush3.bf16.msra.mxu1 %v2489_v24  ;;  %v2507_v24 = vld [vmem:[%s3314_s5 + $0x8] sm:$0xff]  }
  0x29   :  { %2317 = vmatprep.subr.bf16.mxu1 %v2617_v1 }
  0x2a   :  { %2298 = vmatpush3.bf16.msra.mxu0 %v2490_v25 }
  0x2b   :  { %2299 = vmatprep.subr.bf16.mxu0 %v2617_v1 }
  0x2c   :  { %2318 = vmatpush3.bf16.msra.mxu1 %v2491_v26 }
  0x2d   :  { %2319 = vmatprep.subr.bf16.mxu1 %v2617_v1 }
  0x2e   :  { %2300 = vmatpush3.bf16.msra.mxu0 %v2492_v27 }
  0x2f   :  { %2301 = vmatprep.subr.bf16.mxu0 %v2617_v1 }
  0x30   :  { %2320 = vmatpush3.bf16.msra.mxu1 %v2493_v28 }
  0x31   :  { %2321 = vmatprep.subr.bf16.mxu1 %v2617_v1 }
  0x32   :  { %2302 = vmatpush3.bf16.msra.mxu0 %v2494_v29 }
  0x33   :  { %2303 = vmatprep.subr.bf16.mxu0 %v2617_v1 }
  0x34   :  { %2322 = vmatpush3.bf16.msra.mxu1 %v2495_v30 }
  0x35   :  { %2323 = vmatprep.subr.bf16.mxu1 %v2617_v1 }
  0x36   :  { %2304 = vmatpush3.bf16.msra.mxu0 %v2496_v31 }
  0x37   :  { %2329 = vmatprep.subr.bf16.mxu0 %v2617_v1 }
  0x38   :  { %2324 = vmatpush3.bf16.msra.mxu1 %v2497_v32 }
  0x39   :  { %2349 = vmatprep.subr.bf16.mxu1 %v2617_v1 }
  0xe4   :  { %v165_v33 = vpop.f32.mrb[0].mxu0 }
  0xe5   :  { %v2269_v34 = vpop.f32.mrb[1].mxu0 }
  0xe6   :  { %v220_v35 = vpop.f32.mrb[0].mxu1  ;;  %v168_v36 = vpop.f32.mrb[2].mxu0 }
  0xe7   :  { %v221_v37 = vadd.f32 %v220_v35, %v165_v33  ;;  %v2275_v38 = vpop.f32.mrb[1].mxu1  ;;  %v2270_v39 = vpop.f32.mrb[3].mxu0 }
  0xe8   :  { %v223_v41 = vpop.f32.mrb[2].mxu1 }
  0xe9   :  { %v224_v42 = vadd.f32 %v223_v41, %v168_v36  ;;  %v2276_v43 = vpop.f32.mrb[3].mxu1 }
  0xec   :  { %v280_v45 = vpop.f32.mrb[4].mxu0 }
  0xed   :  { %v287_v46 = vadd.f32 %v280_v45, %v221_v37  ;;  %v2281_v47 = vpop.f32.mrb[5].mxu0 }
  0xee   :  { %v344_v48 = vpop.f32.mrb[4].mxu1  ;;  %v283_v50 = vpop.f32.mrb[6].mxu0 }
  0xef   :  { %v351_v51 = vadd.f32 %v344_v48, %v287_v46  ;;  %v2287_v52 = vpop.f32.mrb[5].mxu1  ;;  %v288_v53 = vadd.f32 %v283_v50, %v224_v42  ;;  %v2282_v55 = vpop.f32.mrb[7].mxu0 }
  0xf0   :  { %v347_v56 = vpop.f32.mrb[6].mxu1 }
  0xf1   :  { %v360_v57 = vadd.f32 %v2041_v49, %v351_v51  ;;  %v352_v58 = vadd.f32 %v347_v56, %v288_v53  ;;  %v2288_v59 = vpop.f32.mrb[7].mxu1 }
  0xf3   :  { %v362_v60 = vmax.f32 %v360_v57, 0.0  ;;  %v361_v63 = vadd.f32 %v2041_v49, %v352_v58  ;;  %v2098_v49 = vld [vmem:[%s3319_s1] ss:$0 sm:$0xff] }
  0xf5   :  { %v363_v0 = vmax.f32 %v361_v63, 0.0  ;;  %v364_v2 = vrot.slane %v362_v60, 7  ;;  %v2509_v63 = vld [vmem:[%s3314_s5 + $0x28] sm:$0xff]  }
  0xf7   :  { %v365_v5 = vrot.slane %v363_v0, 7 }
  0xf9   :  { %v367_v6 = vsel %vm366_vm2, %v364_v2, %v365_v5  ;;  %v368_v7 = vsel %vm366_vm2, %v365_v5, %v364_v2  ;;  %v2511_v2 = vld [vmem:[%s3314_s5 + $0x18] sm:$0xff]   ;;  %v2512_v5 = vld [vmem:[%s3281_s7] sm:$0xff]  }
  0xfa   :  { %v373_v8 = vsel %vm2879_vm3, %v368_v7, 0.0  ;;  %v374_v9 = vsel %vm2885_vm4, %v367_v6, 0.0  ;;  %v2513_v6 = vld [vmem:[%s3282_s8] sm:$0xff]  }
  0xfb   :  { %v375_v10 = vmax.f32 %v362_v60, %v373_v8  ;;  %v376_v13 = vmax.f32 %v363_v0, %v374_v9  ;;  %v2510_v0 = vld [vmem:[%s3314_s5 + $0x10] sm:$0xff]  }
  0xfd   :  { %v377_v15 = vpack.c.bf16 %v376_v13, %v375_v10 }
  0xff   :  { %2306 = vmatmul.mubr.bf16.vlgmr.msra.gmra.mrb[8].mxu0 %v377_v15  ;;  %2326 = vmatmul.mubr.bf16.vlgmr.msra.gmra.mrb[8].mxu1 %v377_v15 }
 0x100   :  { %2330 = vmatpush3.bf16.msra.mxu0 %v2498_v14  ;;  %2345 = vmatprep.mubr.msk.bf16.mxu0 %vm2618_vm1, %v2617_v1 }
 0x101   :  { %2331 = vmatprep.subr.bf16.mxu0 %v2617_v1  ;;  %2353 = vmatprep.mubr.msk.bf16.mxu1 %vm2618_vm1, %v2617_v1 }
 0x102   :  { %2350 = vmatpush3.bf16.msra.mxu1 %v2506_v23 }
 0x103   :  { %2351 = vmatprep.subr.bf16.mxu1 %v2617_v1 }
 0x104   :  { %2332 = vmatpush3.bf16.msra.mxu0 %v2499_v16 }
 0x105   :  { %2333 = vmatprep.subr.bf16.mxu0 %v2617_v1 }
 0x106   :  { %2352 = vmatpush3.bf16.msra.mxu1 %v2507_v24 }
 0x107   :  { %2357 = vmatprep.subr.bf16.mxu1 %v2617_v1 }
 0x108   :  { %2334 = vmatpush3.bf16.msra.mxu0 %v2500_v17 }
 0x109   :  { %2335 = vmatprep.subr.bf16.mxu0 %v2617_v1 }
 0x10c   :  { %2336 = vmatpush3.bf16.msra.mxu0 %v2501_v18 }
 0x10d   :  { %2337 = vmatprep.subr.bf16.mxu0 %v2617_v1 }
 0x110   :  { %2338 = vmatpush3.bf16.msra.mxu0 %v2502_v19 }
 0x111   :  { %2339 = vmatprep.subr.bf16.mxu0 %v2617_v1 }
 0x114   :  { %2340 = vmatpush3.bf16.msra.mxu0 %v2503_v20 }
 0x115   :  { %2341 = vmatprep.subr.bf16.mxu0 %v2617_v1 }
 0x118   :  { %2342 = vmatpush3.bf16.msra.mxu0 %v2504_v21 }
 0x119   :  { %2343 = vmatprep.subr.bf16.mxu0 %v2617_v1 }
 0x11c   :  { %2344 = vmatpush3.bf16.msra.mxu0 %v2505_v22 }
 0x11d   :  { %2379 = vmatprep.subr.bf16.mxu0 %v2617_v1 }
 0x11f   :  { %2346 = vmatmul.mubr.bf16.vlgmr.msra.gmra.mrb[12].mxu0 %v377_v15 }
 0x120   :  { %2383 = vmatprep.mubr.msk.bf16.mxu0 %vm2618_vm1, %v2617_v1  ;;  %2380 = vmatpush3.bf16.msra.mxu0 %v2513_v6 }
 0x121   :  { %2381 = vmatprep.subr.bf16.mxu0 %v2617_v1 }
 0x124   :  { %2382 = vmatpush3.bf16.msra.mxu0 %v2514_v4 }
 0x125   :  { %2395 = vmatprep.subr.bf16.mxu0 %v2617_v1 }
 0x1d2   :  { %v476_v25 = vpop.f32.mrb[8].mxu0  ;;  %v599_v26 = vpop.f32.mrb[8].mxu1 }
 0x1d3   :  { %v2307_v27 = vpop.f32.mrb[9].mxu0  ;;  %v2327_v28 = vpop.f32.mrb[9].mxu1  ;;  %v606_v31 = vrot.slane %v476_v25, 7  ;;  %v701_v32 = vrot.slane %v599_v26, 1 }
 0x1d4   :  { %v479_v29 = vpop.f32.mrb[10].mxu0  ;;  %v602_v30 = vpop.f32.mrb[10].mxu1 }
 0x1d5   :  { %v607_v33 = vrot.slane %v479_v29, 7  ;;  %v702_v34 = vrot.slane %v602_v30, 1  ;;  %v2308_v35 = vpop.f32.mrb[11].mxu0  ;;  %v2328_v36 = vpop.f32.mrb[11].mxu1  ;;  %v2116_v30 = vld [vmem:[%s3280_s6] ss:$0 sm:$0xff] }
 0x1d7   :  { %v609_v37 = vsel %vm366_vm2, %v607_v33, %v606_v31  ;;  %v704_v38 = vsel %vm703_vm5, %v701_v32, %v702_v34  ;;  %v608_v39 = vsel %vm366_vm2, %v606_v31, %v607_v33  ;;  %v705_v40 = vsel %vm703_vm5, %v702_v34, %v701_v32 }
 0x1d8   :  { %v610_v42 = vsel %vm2879_vm3, %v609_v37, 0.0  ;;  %v710_v48 = vsel %vm2954_vm6, %v704_v38, 0.0  ;;  %v611_v50 = vsel %vm2885_vm4, %v608_v39, 0.0  ;;  %v711_v54 = vsel %vm2962_vm7, %v705_v40, 0.0 }
 0x1f2   :  { %v694_v43 = vpop.f32.mrb[12].mxu0 }
 0x1f3   :  { %v695_v45 = vadd.f32 %v694_v43, %v610_v42  ;;  %v2347_v46 = vpop.f32.mrb[13].mxu0 }
 0x1f4   :  { %v697_v51 = vpop.f32.mrb[14].mxu0 }
 0x1f5   :  { %v712_v52 = vadd.f32 %v710_v48, %v695_v45  ;;  %v698_v53 = vadd.f32 %v697_v51, %v611_v50  ;;  %v2348_v55 = vpop.f32.mrb[15].mxu0 }
 0x1f7   :  { %v721_v56 = vadd.f32 %v2098_v49, %v712_v52  ;;  %v713_v57 = vadd.f32 %v711_v54, %v698_v53 }
 0x1f9   :  { %v722_v58 = vadd.f32 %v2098_v49, %v713_v57  ;;  %v723_v59 = vmax.f32 %v721_v56, 0.0 }
 0x1fb   :  { %v724_v60 = vmax.f32 %v722_v58, 0.0  ;;  %v2515_v58 = vld [vmem:[%s3282_s8 + $0x10] sm:$0xff]  }
 0x1fd   :  { %v725_v62 = vpack.c.bf16 %v724_v60, %v723_v59  ;;  %v2516_v59 = vld [vmem:[%s3282_s8 + $0x18] sm:$0xff]  }
 0x1ff   :  { %2354 = vmatmul.mubr.msk.bf16.vlgmr.msra.gmra.mrb[12].mxu1 %vm742_vm8, %v725_v62 }
 0x200   :  { %2358 = vmatpush3.bf16.msra.mxu1 %v2508_v61  ;;  %2361 = vmatprep.mubr.msk.bf16.mxu1 %vm2618_vm1, %v2617_v1 }
 0x201   :  { %2359 = vmatprep.subr.bf16.mxu1 %v2617_v1 }
 0x204   :  { %2360 = vmatpush3.bf16.msra.mxu1 %v2509_v63 }
 0x205   :  { %2365 = vmatprep.subr.bf16.mxu1 %v2617_v1 }
 0x207   :  { %2362 = vmatmul.mubr.msk.bf16.vlgmr.msra.gmra.mrb[16].mxu1 %vm742_vm8, %v725_v62 }
 0x208   :  { %2366 = vmatpush3.bf16.msra.mxu1 %v2510_v0  ;;  %2369 = vmatprep.mubr.msk.bf16.mxu1 %vm2618_vm1, %v2617_v1 }
 0x209   :  { %2367 = vmatprep.subr.bf16.mxu1 %v2617_v1 }
 0x20c   :  { %2368 = vmatpush3.bf16.msra.mxu1 %v2511_v2 }
 0x20d   :  { %2373 = vmatprep.subr.bf16.mxu1 %v2617_v1 }
 0x20f   :  { %2370 = vmatmul.mubr.msk.bf16.vlgmr.msra.gmra.mrb[20].mxu1 %vm742_vm8, %v725_v62 }
 0x210   :  { %2375 = vmatprep.mubr.msk.bf16.mxu1 %vm2618_vm1, %v2617_v1  ;;  %2374 = vmatpush3.bf16.msra.mxu1 %v2512_v5 }
 0x211   :  { %2387 = vmatprep.subr.bf16.mxu1 %v2617_v1 }
 0x2d2   :  { %v780_v7 = vpop.f32.mrb[12].mxu1 }
 0x2d3   :  { %v2355_v8 = vpop.f32.mrb[13].mxu1  ;;  %v850_v10 = vrot.slane %v780_v7, 7 }
 0x2d4   :  { %v783_v9 = vpop.f32.mrb[14].mxu1 }
 0x2d5   :  { %v851_v13 = vrot.slane %v783_v9, 7  ;;  %v2356_v14 = vpop.f32.mrb[15].mxu1 }
 0x2d7   :  { %v853_v15 = vsel %vm366_vm2, %v851_v13, %v850_v10  ;;  %v852_v16 = vsel %vm366_vm2, %v850_v10, %v851_v13 }
 0x2d8   :  { %v854_v25 = vsel %vm2879_vm3, %v853_v15, 0.0  ;;  %v855_v31 = vsel %vm2885_vm4, %v852_v16, 0.0 }
 0x2da   :  { %v843_v17 = vpop.f32.mrb[16].mxu1 }
 0x2db   :  { %v2363_v18 = vpop.f32.mrb[17].mxu1  ;;  %v909_v20 = vrot.slane %v843_v17, 1 }
 0x2dc   :  { %v846_v19 = vpop.f32.mrb[18].mxu1  ;;  %v2130_v18 = vld [vmem:[%s3283_s9 + $0x1] ss:$0 sm:$0xff] }
 0x2dd   :  { %v910_v21 = vrot.slane %v846_v19, 1  ;;  %v2364_v22 = vpop.f32.mrb[19].mxu1 }
 0x2df   :  { %v911_v23 = vsel %vm703_vm5, %v909_v20, %v910_v21  ;;  %v912_v24 = vsel %vm703_vm5, %v910_v21, %v909_v20 }
 0x2e0   :  { %v913_v29 = vsel %vm2954_vm6, %v911_v23, 0.0  ;;  %v914_v3 = vsel %vm2962_vm7, %v912_v24, 0.0 }
 0x2e2   :  { %v902_v26 = vpop.f32.mrb[20].mxu1 }
 0x2e3   :  { %v903_v27 = vadd.f32 %v902_v26, %v854_v25  ;;  %v2371_v28 = vpop.f32.mrb[21].mxu1 }
 0x2e4   :  { %v905_v32 = vpop.f32.mrb[22].mxu1 }
 0x2e5   :  { %v915_v33 = vadd.f32 %v913_v29, %v903_v27  ;;  %v906_v44 = vadd.f32 %v905_v32, %v855_v31  ;;  %v2372_v34 = vpop.f32.mrb[23].mxu1  ;;  %v2517_v31 = vld [vmem:[%s3282_s8 + $0x20] sm:$0xff]   ;;  %v2518_v32 = vld [vmem:[%s3282_s8 + $0x28] sm:$0xff]  }
 0x2e7   :  { %v924_v35 = vadd.f32 %v2116_v30, %v915_v33  ;;  %v916_v36 = vadd.f32 %v914_v3, %v906_v44 }
 0x2e9   :  { %v925_v37 = vadd.f32 %v2116_v30, %v916_v36  ;;  %v926_v38 = vadd.f32 %v924_v35, %v2776_v11 }
 0x2eb   :  { %v927_v39 = vadd.f32 %v925_v37, %v2781_v12  ;;  %v2119_v12 = vld [vmem:[%s3283_s9] ss:$0 sm:$0xff] }
 0x2ed   :  { %v928_v40 = vpack.c.bf16 %v927_v39, %v926_v38 }
 0x2ef   :  { %2376 = vmatmul.mubr.msk.bf16.vlgmr.msra.gmra.mrb[24].mxu1 %vm127_vm0, %v928_v40 }
 0x2f0   :  { %2391 = vmatprep.mubr.msk.bf16.mxu1 %vm2618_vm1, %v2617_v1  ;;  %2388 = vmatpush3.bf16.msra.mxu1 %v2515_v58 }
 0x2f1   :  { %2389 = vmatprep.subr.bf16.mxu1 %v2617_v1 }
 0x2f4   :  { %2390 = vmatpush3.bf16.msra.mxu1 %v2516_v59  ;;  %v2519_v59 = vld [vmem:[%s3282_s8 + $0x30] sm:$0xff]  }
 0x2f5   :  { %2403 = vmatprep.subr.bf16.mxu1 %v2617_v1 }
 0x3c2   :  { %v974_v41 = vpop.f32.mrb[24].mxu1 }
 0x3c3   :  { %v2377_v42 = vpop.f32.mrb[25].mxu1 }
 0x3c4   :  { %v977_v43 = vpop.f32.mrb[26].mxu1 }
 0x3c5   :  { %v981_v45 = vpack.c.bf16 %v977_v43, %v974_v41  ;;  %v2378_v11 = vpop.f32.mrb[27].mxu1 }
 0x3c7   :  { %2384 = vmatmul.mubr.msk.bf16.vlgmr.msra.gmra.mrb[16].mxu0 %vm742_vm8, %v981_v45 }
 0x3c8   :  { %2399 = vmatprep.mubr.msk.bf16.mxu0 %vm2618_vm1, %v2617_v1  ;;  %2396 = vmatpush3.bf16.msra.mxu0 %v2517_v31 }
 0x3c9   :  { %2397 = vmatprep.subr.bf16.mxu0 %v2617_v1 }
 0x3cc   :  { %2398 = vmatpush3.bf16.msra.mxu0 %v2518_v32  ;;  %v2521_v32 = vld [vmem:[%s3284_s10] sm:$0xff]  }
 0x3cd   :  { %2411 = vmatprep.subr.bf16.mxu0 %v2617_v1 }
 0x49a   :  { %v1042_v46 = vpop.f32.mrb[16].mxu0 }
 0x49b   :  { %v1043_v47 = vadd.f32 %v2119_v12, %v1042_v46  ;;  %v2385_v48 = vpop.f32.mrb[17].mxu0  ;;  %v2141_v46 = vld [vmem:[%s3283_s9 + $0x2] ss:$0 sm:$0xff] }
 0x49c   :  { %v1045_v49 = vpop.f32.mrb[18].mxu0 }
 0x49d   :  { %v2123_v50 = vmul.f32 -1.442695, %v1043_v47  ;;  %v1046_v51 = vadd.f32 %v2119_v12, %v1045_v49  ;;  %v2386_v52 = vpop.f32.mrb[19].mxu0  ;;  %v1049_v2 = vmax.f32 %v1043_v47, 0.0 }
 0x49f   :  { %2525 = vpow2.f32 %v2123_v50  ;;  %v2124_v53 = vmul.f32 -1.442695, %v1046_v51  ;;  %v1050_v10 = vmax.f32 %v1046_v51, 0.0 }
 0x4a1   :  { %2527 = vpow2.f32 %v2124_v53 }
 0x4a9   :  { %v2526_v55 = vpop.eup %2525 }
 0x4aa   :  { %v1057_v54 = vadd.f32 1.0, %v2526_v55 }
 0x4ab   :  { %v2528_v56 = vpop.eup %2527 }
 0x4ac   :  { %2529 = vrcp.f32 %v1057_v54  ;;  %v1058_v57 = vadd.f32 1.0, %v2528_v56 }
 0x4ae   :  { %2531 = vrcp.f32 %v1058_v57 }
 0x4b6   :  { %v2530_v60 = vpop.eup %2529 }
 0x4b7   :  { %1065 = vrot.lane.b32.xlu0 %v2530_v60, %s2619_s28  ;;  %v1073_v61 = vsub.f32 1.0, %v2530_v60  ;;  %v2520_v60 = vld [vmem:[%s3282_s8 + $0x38] sm:$0xff]  }
 0x4b8   :  { %v2532_v62 = vpop.eup %2531 }
 0x4b9   :  { %1077 = vrot.lane.b32.xlu1 %v1073_v61, %s2619_s28  ;;  %v1074_v63 = vsub.f32 1.0, %v2532_v62 }
 0x4bb   :  { %1067 = vrot.lane.b32.xlu0 %v2532_v62, %s2619_s28 }
 0x4bd   :  { %1079 = vrot.lane.b32.xlu1 %v1074_v63, %s2619_s28 }
 0x529   :  { %v1066_v0 = vpop.permute.xlu0 %1065 }
 0x52a   :  { %v1071_v6 = vmul.f32 %v1066_v0, %v1049_v2 }
 0x52b   :  { %v1078_v5 = vpop.permute.xlu1 %1077 }
 0x52c   :  { %v1083_v7 = vmul.f32 %v1078_v5, %v974_v41 }
 0x52d   :  { %v1068_v8 = vpop.permute.xlu0 %1067 }
 0x52e   :  { %v1085_v9 = vadd.f32 %v1083_v7, %v1071_v6  ;;  %v1072_v14 = vmul.f32 %v1068_v8, %v1050_v10 }
 0x52f   :  { %v1080_v13 = vpop.permute.xlu1 %1079 }
 0x530   :  { %v1084_v15 = vmul.f32 %v1080_v13, %v977_v43 }
 0x532   :  { %v1086_v16 = vadd.f32 %v1084_v15, %v1072_v14 }
 0x534   :  { %v1087_v17 = vpack.c.bf16 %v1086_v16, %v1085_v9 }
 0x536   :  { %2392 = vmatmul.mubr.msk.bf16.vlgmr.msra.gmra.mrb[28].mxu1 %vm742_vm8, %v1087_v17 }
 0x537   :  { %2407 = vmatprep.mubr.msk.bf16.mxu1 %vm2618_vm1, %v2617_v1  ;;  %2404 = vmatpush3.bf16.msra.mxu1 %v2519_v59  ;;  %v2158_v59 = vld [vmem:[%s3286_s12] ss:$0 sm:$0xff]  ;;  %s3176_s12 = smov 0  }
 0x538   :  { %2405 = vmatprep.subr.bf16.mxu1 %v2617_v1 }
 0x53b   :  { %2406 = vmatpush3.bf16.msra.mxu1 %v2520_v60  ;;  %v2162_v60 = vld [vmem:[%s3290_s16] ss:$0 sm:$0xff] }
 0x53c   :  { %2419 = vmatprep.subr.bf16.mxu1 %v2617_v1 }
 0x609   :  { %v1150_v19 = vpop.f32.mrb[28].mxu1 }
 0x60a   :  { %v1151_v20 = vadd.f32 %v2130_v18, %v1150_v19  ;;  %v2393_v21 = vpop.f32.mrb[29].mxu1  ;;  %v2152_v19 = vld [vmem:[%s3283_s9 + $0x3] ss:$0 sm:$0xff] }
 0x60b   :  { %v1153_v22 = vpop.f32.mrb[30].mxu1 }
 0x60c   :  { %v2134_v23 = vmul.f32 -1.442695, %v1151_v20  ;;  %v1154_v24 = vadd.f32 %v2130_v18, %v1153_v22  ;;  %v2394_v25 = vpop.f32.mrb[31].mxu1  ;;  %v1157_v38 = vmax.f32 %v1151_v20, 0.0 }
 0x60e   :  { %2533 = vpow2.f32 %v2134_v23  ;;  %v2135_v26 = vmul.f32 -1.442695, %v1154_v24  ;;  %v1158_v39 = vmax.f32 %v1154_v24, 0.0 }
 0x610   :  { %2535 = vpow2.f32 %v2135_v26 }
 0x618   :  { %v2534_v27 = vpop.eup %2533 }
 0x619   :  { %v1165_v28 = vadd.f32 1.0, %v2534_v27 }
 0x61a   :  { %v2536_v29 = vpop.eup %2535 }
 0x61b   :  { %2537 = vrcp.f32 %v1165_v28  ;;  %v1166_v30 = vadd.f32 1.0, %v2536_v29 }
 0x61d   :  { %2539 = vrcp.f32 %v1166_v30 }
 0x625   :  { %v2538_v33 = vpop.eup %2537 }
 0x626   :  { %1173 = vrot.lane.b32.xlu0 %v2538_v33, %s2619_s28  ;;  %v1181_v34 = vsub.f32 1.0, %v2538_v33  ;;  %v2522_v33 = vld [vmem:[%s3288_s14] sm:$0xff]  }
 0x627   :  { %v2540_v44 = vpop.eup %2539 }
 0x628   :  { %1175 = vrot.lane.b32.xlu1 %v2540_v44, %s2619_s28  ;;  %v1182_v3 = vsub.f32 1.0, %v2540_v44  ;;  %v2523_v44 = vld [vmem:[%s3284_s10 + $0x8] sm:$0xff]  }
 0x62a   :  { %1185 = vrot.lane.b32.xlu0 %v1181_v34, %s2619_s28  ;;  %v2524_v34 = vld [vmem:[%s3288_s14 + $0x8] sm:$0xff]  }
 0x62c   :  { %1187 = vrot.lane.b32.xlu1 %v1182_v3, %s2619_s28 }
 0x698   :  { %v1174_v35 = vpop.permute.xlu0 %1173 }
 0x699   :  { %v1179_v41 = vmul.f32 %v1174_v35, %v1157_v38 }
 0x69a   :  { %v1176_v36 = vpop.permute.xlu1 %1175 }
 0x69b   :  { %v1180_v42 = vmul.f32 %v1176_v36, %v1158_v39 }
 0x69c   :  { %v1186_v37 = vpop.permute.xlu0 %1185 }
 0x69d   :  { %v1191_v40 = vmul.f32 %v1186_v37, %v1085_v9 }
 0x69e   :  { %v1188_v4 = vpop.permute.xlu1 %1187 }
 0x69f   :  { %v1192_v43 = vmul.f32 %v1188_v4, %v1086_v16  ;;  %v1193_v45 = vadd.f32 %v1191_v40, %v1179_v41 }
 0x6a1   :  { %v1194_v11 = vadd.f32 %v1192_v43, %v1180_v42 }
 0x6a3   :  { %v1195_v12 = vpack.c.bf16 %v1194_v11, %v1193_v45 }
 0x6a5   :  { %2400 = vmatmul.mubr.msk.bf16.vlgmr.msra.gmra.mrb[20].mxu0 %vm742_vm8, %v1195_v12 }
 0x6a6   :  { %2415 = vmatprep.mubr.msk.bf16.mxu0 %vm2618_vm1, %v2617_v1  ;;  %2412 = vmatpush3.bf16.msra.mxu0 %v2521_v32 }
 0x6a7   :  { %2413 = vmatprep.subr.bf16.mxu0 %v2617_v1 }
 0x6aa   :  { %2414 = vmatpush3.bf16.msra.mxu0 %v2523_v44 }
 0x778   :  { %v1258_v47 = vpop.f32.mrb[20].mxu0 }
 0x779   :  { %v1259_v48 = vadd.f32 %v2141_v46, %v1258_v47  ;;  %v2401_v49 = vpop.f32.mrb[21].mxu0 }
 0x77a   :  { %v1261_v50 = vpop.f32.mrb[22].mxu0  ;;  %v3119_v49 = vld [vmem:[%s3285_s11] sm:$0xf] }
 0x77b   :  { %v2145_v51 = vmul.f32 -1.442695, %v1259_v48  ;;  %v1262_v52 = vadd.f32 %v2141_v46, %v1261_v50  ;;  %v2402_v53 = vpop.f32.mrb[23].mxu0  ;;  %v1265_v7 = vmax.f32 %v1259_v48, 0.0  ;;  %v3124_v50 = vld [vmem:[%s3285_s11 + $0x4] sm:$0xf] }
 0x77c   :  { %v3139_v53 = vld [vmem:[%s3287_s13] ss:$0 sm:$0xff] }
 0x77d   :  { %2541 = vpow2.f32 %v2145_v51  ;;  %v2146_v55 = vmul.f32 -1.442695, %v1262_v52  ;;  %v1266_v8 = vmax.f32 %v1262_v52, 0.0  ;;  %v3129_v51 = vld [vmem:[%s3285_s11 + $0x8] sm:$0xf] }
 0x77e   :  { %v3134_v52 = vld [vmem:[%s3285_s11 + $0xc] sm:$0xf] }
 0x77f   :  { %2543 = vpow2.f32 %v2146_v55  ;;  %v3144_v55 = vld [vmem:[%s3289_s15] sm:$0xf] }
 0x787   :  { %v2542_v54 = vpop.eup %2541 }
 0x788   :  { %v1273_v56 = vadd.f32 1.0, %v2542_v54  ;;  %v3149_v54 = vld [vmem:[%s3289_s15 + $0x4] sm:$0xf] }
 0x789   :  { %v2544_v57 = vpop.eup %2543 }
 0x78a   :  { %2545 = vrcp.f32 %v1273_v56  ;;  %v1274_v58 = vadd.f32 1.0, %v2544_v57  ;;  %v3154_v56 = vld [vmem:[%s3289_s15 + $0x8] sm:$0xf]  ;;  %v3159_v57 = vld [vmem:[%s3289_s15 + $0xc] sm:$0xf] }
 0x78c   :  { %2547 = vrcp.f32 %v1274_v58  ;;  %v3164_v58 = vld [vmem:[%s3291_s17] ss:$0 sm:$0xff] }
 0x794   :  { %v2546_v61 = vpop.eup %2545 }
 0x795   :  { %1281 = vrot.lane.b32.xlu0 %v2546_v61, %s2619_s28  ;;  %v1289_v63 = vsub.f32 1.0, %v2546_v61 }
 0x796   :  { %v2548_v62 = vpop.eup %2547 }
 0x797   :  { %1283 = vrot.lane.b32.xlu1 %v2548_v62, %s2619_s28  ;;  %v1290_v0 = vsub.f32 1.0, %v2548_v62 }
 0x799   :  { %1293 = vrot.lane.b32.xlu0 %v1289_v63, %s2619_s28 }
 0x79b   :  { %1295 = vrot.lane.b32.xlu1 %v1290_v0, %s2619_s28 }
 0x807   :  { %v1282_v2 = vpop.permute.xlu0 %1281 }
 0x808   :  { %v1287_v13 = vmul.f32 %v1282_v2, %v1265_v7 }
 0x809   :  { %v1284_v5 = vpop.permute.xlu1 %1283 }
 0x80a   :  { %v1288_v14 = vmul.f32 %v1284_v5, %v1266_v8 }
 0x80b   :  { %v1294_v6 = vpop.permute.xlu0 %1293 }
 0x80c   :  { %v1299_v9 = vmul.f32 %v1294_v6, %v1193_v45 }
 0x80d   :  { %v1296_v10 = vpop.permute.xlu1 %1295 }
 0x80e   :  { %v1300_v15 = vmul.f32 %v1296_v10, %v1194_v11  ;;  %v1301_v16 = vadd.f32 %v1299_v9, %v1287_v13 }
 0x810   :  { %v1302_v17 = vadd.f32 %v1300_v15, %v1288_v14 }
 0x812   :  { %v1303_v18 = vpack.c.bf16 %v1302_v17, %v1301_v16 }
 0x814   :  { %2408 = vmatmul.mubr.msk.bf16.vlgmr.msra.gmra.mrb[32].mxu1 %vm742_vm8, %v1303_v18 }
 0x815   :  { %2423 = vmatprep.mubr.msk.bf16.mxu1 %vm2618_vm1, %v2617_v1  ;;  %2420 = vmatpush3.bf16.msra.mxu1 %v2522_v33 }
 0x816   :  { %2421 = vmatprep.subr.bf16.mxu1 %v2617_v1 }
 0x819   :  { %2422 = vmatpush3.bf16.msra.mxu1 %v2524_v34 }
 0x8e7   :  { %v1366_v20 = vpop.f32.mrb[32].mxu1 }
 0x8e8   :  { %v1367_v21 = vadd.f32 %v2152_v19, %v1366_v20  ;;  %v2409_v22 = vpop.f32.mrb[33].mxu1 }
 0x8e9   :  { %v1369_v23 = vpop.f32.mrb[34].mxu1 }
 0x8ea   :  { %v2156_v24 = vmul.f32 -1.442695, %v1367_v21  ;;  %v1370_v25 = vadd.f32 %v2152_v19, %v1369_v23  ;;  %v2410_v26 = vpop.f32.mrb[35].mxu1  ;;  %v1373_v4 = vmax.f32 %v1367_v21, 0.0 }
 0x8ec   :  { %2549 = vpow2.f32 %v2156_v24  ;;  %v2157_v27 = vmul.f32 -1.442695, %v1370_v25  ;;  %v1374_v41 = vmax.f32 %v1370_v25, 0.0 }
 0x8ee   :  { %2551 = vpow2.f32 %v2157_v27 }
 0x8f6   :  { %v2550_v28 = vpop.eup %2549 }
 0x8f7   :  { %v1381_v29 = vadd.f32 1.0, %v2550_v28 }
 0x8f8   :  { %v2552_v30 = vpop.eup %2551 }
 0x8f9   :  { %2553 = vrcp.f32 %v1381_v29  ;;  %v1382_v31 = vadd.f32 1.0, %v2552_v30 }
 0x8fb   :  { %2555 = vrcp.f32 %v1382_v31 }
 0x903   :  { %v2554_v3 = vpop.eup %2553 }
 0x904   :  { %1389 = vrot.lane.b32.xlu0 %v2554_v3, %s2619_s28  ;;  %v1397_v36 = vsub.f32 1.0, %v2554_v3 }
 0x905   :  { %v2556_v35 = vpop.eup %2555 }
 0x906   :  { %1391 = vrot.lane.b32.xlu1 %v2556_v35, %s2619_s28  ;;  %v1398_v37 = vsub.f32 1.0, %v2556_v35 }
 0x908   :  { %1401 = vrot.lane.b32.xlu0 %v1397_v36, %s2619_s28 }
 0x90a   :  { %1403 = vrot.lane.b32.xlu1 %v1398_v37, %s2619_s28 }
 0x976   :  { %v1390_v38 = vpop.permute.xlu0 %1389 }
 0x977   :  { %v1395_v45 = vmul.f32 %v1390_v38, %v1373_v4 }
 0x978   :  { %v1392_v39 = vpop.permute.xlu1 %1391 }
 0x979   :  { %v1396_v11 = vmul.f32 %v1392_v39, %v1374_v41 }
 0x97a   :  { %v1402_v40 = vpop.permute.xlu0 %1401 }
 0x97b   :  { %v1407_v42 = vmul.f32 %v1402_v40, %v1301_v16 }
 0x97c   :  { %v1404_v43 = vpop.permute.xlu1 %1403 }
 0x97d   :  { %v1408_v12 = vmul.f32 %v1404_v43, %v1302_v17  ;;  %v1409_v46 = vadd.f32 %v1407_v42, %v1395_v45 }
 0x97f   :  { %v1410_v47 = vadd.f32 %v1408_v12, %v1396_v11 }
 0x981   :  { %v1411_v48 = vpack.c.bf16 %v1410_v47, %v1409_v46 }
 0x983   :  { %2416 = vmatmul.mubr.msk.bf16.vlgmr.msra.gmra.mrb[24].mxu0 %vm742_vm8, %v1411_v48  ;;  %2424 = vmatmul.mubr.msk.bf16.vlgmr.msra.gmra.mrb[36].mxu1 %vm742_vm8, %v1411_v48 }
 0xa56   :  { %v1472_v61 = vpop.f32.mrb[24].mxu0  ;;  %v1539_v62 = vpop.f32.mrb[36].mxu1 }
 0xa57   :  { %v1473_v63 = vadd.f32 %v2158_v59, %v1472_v61  ;;  %v1540_v0 = vadd.f32 %v2162_v60, %v1539_v62  ;;  %v2417_v2 = vpop.f32.mrb[25].mxu0  ;;  %v2425_v5 = vpop.f32.mrb[37].mxu1 }
 0xa58   :  { %v1475_v6 = vpop.f32.mrb[26].mxu0  ;;  %v1542_v7 = vpop.f32.mrb[38].mxu1 }
 0xa59   :  { %1480 = vst.msk [vmem:[#allocation2] sm:$0xff] %vm1479_vm10, %v1473_v63  ;;  %1546 = vst.msk [vmem:[#allocation3] sm:$0xff] %vm1479_vm10, %v1540_v0  ;;  %v1476_v8 = vadd.f32 %v2158_v59, %v1475_v6  ;;  %v1543_v9 = vadd.f32 %v2162_v60, %v1542_v7  ;;  %v2418_v10 = vpop.f32.mrb[27].mxu0  ;;  %v2426_v13 = vpop.f32.mrb[39].mxu1 }
 0xa5b   :  { %1481 = vst.msk [vmem:[#allocation2 + $0x8] sm:$0xff] %vm1479_vm10, %v1476_v8  ;;  %1547 = vst.msk [vmem:[#allocation3 + $0x8] sm:$0xff] %vm1479_vm10, %v1543_v9 }
 0xa5c LB: > { %v2167_v14 = vcombine.low %v3119_v49, %v3124_v50  ;;  %v2173_v15 = vcombine.low %v3144_v55, %v3149_v54  ;;  %v2620_v16 = vmov 0.0   ;;  %v2168_v17 = vcombine.low %v3129_v51, %v3134_v52  ;;  %v3187_v18 = vld [vmem:[#allocation4] sm:$0x3]  ;;  %v3191_v20 = vld [vmem:[#allocation5] sm:$0x3]  ;;  %s2622_s15 = smov 64   ;;  %s2615_s12 = sphi %s3176_s12, %s1566_s12  }
 0xa5d   : > { %2427 = vmatprep.subr.bf16.mxu0 %v2620_v16  ;;  %2435 = vmatprep.subr.bf16.mxu1 %v2620_v16  ;;  %v2174_v19 = vcombine.low %v3154_v56, %v3159_v57  ;;  %vm2621_vm11 = vmmov 0   ;;  %v1571_v21 = vpack.c.bf16 %v3187_v18, %v3187_v18  ;;  %v1719_v22 = vpack.c.bf16 %v3191_v20, %v3191_v20  ;;  %s1714_s16 = ssub.s32 7, %s2615_s12  ;;  %s1567_s17 = scalar_lea.vmem [#allocation2], %s2615_s12 }
 0xa5e   : > { %2428 = vmatpush3.bf16.msra.mxu0 %v2167_v14  ;;  %2436 = vmatpush3.bf16.msra.mxu1 %v2173_v15  ;;  %s1715_s14 = scalar_lea.vmem [#allocation3], %s1714_s16  ;;  %v1684_v14 = vrot.slane %v3187_v18, 1  ;;  %s2623_s28 = smov 32   ;;  %v1832_v15 = vrot.slane %v3191_v20, 1  ;;  %vm1698_vm12 = vcmask 1041409   ;;  %vm1711_vm13 = vcmask 253952  }
 0xa5f   : > { %2429 = vmatprep.subr.bf16.mxu0 %v2620_v16  ;;  %2431 = vmatprep.mubr.msk.bf16.mxu0 %vm2621_vm11, %v2620_v16  ;;  %s2624_s5 = smov 96   ;;  %s1710_s22 = scalar_lea.vmem [#allocation6], %s2615_s12 }
 0xa60   : > { %2437 = vmatprep.subr.bf16.mxu1 %v2620_v16  ;;  %2439 = vmatprep.mubr.msk.bf16.mxu1 %vm2621_vm11, %v2620_v16  ;;  %s1857_s7 = scalar_lea.vmem [#allocation7], %s1714_s16  ;;  %s1566_s12 = sadd.s32 1, %s2615_s12  }
 0xa61   : > { %p1563_p0 = scmp.ge.s32.totalorder %s1566_s12, 8  }
 0xa62   : > { %2430 = vmatpush3.bf16.msra.mxu0 %v2168_v17  ;;  %2438 = vmatpush3.bf16.msra.mxu1 %v2174_v19  ;;  %v1569_v34 = vld [vmem:[%s1567_s17 + $0x8] sm:$0x1]  ;;  %v1568_v3 = vld [vmem:[%s1567_s17] sm:$0x1]  ;;  %vm1995_vm14 = vcmask (%p1563_p0), 195584  }
 0xa63   : > { %v1717_v36 = vld [vmem:[%s1715_s14 + $0x8] sm:$0x1]  ;;  %v1716_v40 = vld [vmem:[%s1715_s14] sm:$0x1]  ;;  %2443 = vmatprep.subr.bf16.mxu0 (%p1563_p0), %v2617_v1  ;;  %2451 = vmatprep.subr.bf16.mxu1 (%p1563_p0), %v2617_v1 }
 0xa64   :  { %v2583_v49 = vld [vmem:[%s3293_s19 + $0x8] sm:$0xff] (%p1563_p0)  }
 0xa65   : > { %2432 = vmatmul.mubr.msk.bf16.vlgmr.msra.gmra.mrb[0].mxu0 %vm742_vm8, %v1571_v21  ;;  %2440 = vmatmul.mubr.msk.bf16.vlgmr.msra.gmra.mrb[0].mxu1 %vm742_vm8, %v1719_v22  ;;  %v2584_v50 = vld [vmem:[%s3292_s18 + $0x8] sm:$0xff] (%p1563_p0)  }
 0xa66   :  { %2447 = vmatprep.mubr.msk.bf16.mxu0 (%p1563_p0), %vm2618_vm1, %v2617_v1  ;;  %2455 = vmatprep.mubr.msk.bf16.mxu1 (%p1563_p0), %vm2618_vm1, %v2617_v1 }
 0xb38   : > { %v1627_v23 = vpop.f32.mrb[0].mxu0  ;;  %v1775_v24 = vpop.f32.mrb[0].mxu1 }
 0xb39   : > { %v1628_v25 = vadd.f32 %v3139_v53, %v1627_v23  ;;  %v2433_v26 = vpop.f32.mrb[1].mxu0  ;;  %v1776_v27 = vadd.f32 %v3164_v58, %v1775_v24  ;;  %v2441_v28 = vpop.f32.mrb[1].mxu1 }
 0xb3a   : > { %v1630_v29 = vpop.f32.mrb[2].mxu0  ;;  %v1778_v30 = vpop.f32.mrb[2].mxu1 }
 0xb3b   : > { %1651 = vrot.lane.b32.xlu1 %v1628_v25, %s2622_s15  ;;  %v2434_v31 = vpop.f32.mrb[3].mxu0  ;;  %v1634_v32 = vrot.slane %v1628_v25, 1  ;;  %v2442_v33 = vpop.f32.mrb[3].mxu1  ;;  %v1782_v44 = vrot.slane %v1776_v27, 1  ;;  %v1637_v37 = vadd.f32 %v1628_v25, %v1568_v3  ;;  %v1785_v41 = vadd.f32 %v1776_v27, %v1716_v40 }
 0xb3d   : > { %1653 = vrot.lane.b32.xlu0 %v1634_v32, %s2622_s15  ;;  %v1638_v35 = vadd.f32 %v1634_v32, %v1569_v34  ;;  %v1786_v39 = vadd.f32 %v1782_v44, %v1717_v36  ;;  %v2170_v4 = vmul.f32 -1.442695, %v1637_v37  ;;  %v2176_v43 = vmul.f32 -1.442695, %v1785_v41 }
 0xb3f   : > { %1799 = vrot.lane.b32.xlu1 %v1776_v27, %s2622_s15  ;;  %v2171_v38 = vmul.f32 -1.442695, %v1638_v35  ;;  %v2177_v42 = vmul.f32 -1.442695, %v1786_v39 }
 0xb41   : > { %1801 = vrot.lane.b32.xlu0 %v1782_v44, %s2622_s15  ;;  %2557 = vpow2.f32 %v2171_v38 }
 0xb42   : > { %2559 = vpow2.f32 %v2170_v4 }
 0xb43   : > { %2561 = vpow2.f32 %v2177_v42 }
 0xb44   : > { %2563 = vpow2.f32 %v2176_v43 }
 0xb4b   : > { %v2558_v45 = vpop.eup %2557 }
 0xb4c   : > { %v2560_v11 = vpop.eup %2559  ;;  %v1646_v12 = vadd.f32 1.0, %v2558_v45 }
 0xb4d   : > { %v2562_v46 = vpop.eup %2561  ;;  %v1645_v47 = vadd.f32 1.0, %v2560_v11 }
 0xb4e   : > { %2565 = vrcp.f32 %v1646_v12  ;;  %v1794_v48 = vadd.f32 1.0, %v2562_v46  ;;  %v2564_v59 = vpop.eup %2563 }
 0xb4f   : > { %2567 = vrcp.f32 %v1645_v47  ;;  %v1793_v60 = vadd.f32 1.0, %v2564_v59 }
 0xb50   : > { %2569 = vrcp.f32 %v1794_v48 }
 0xb51   : > { %2571 = vrcp.f32 %v1793_v60 }
 0xb58   : > { %v2566_v61 = vpop.eup %2565 }
 0xb59   : > { %v2568_v2 = vpop.eup %2567 }
 0xb5a   : > { %v2570_v5 = vpop.eup %2569  ;;  %v1671_v31 = vsub.f32 1.0, %v2568_v2 }
 0xb5b   : > { %v2572_v10 = vpop.eup %2571  ;;  %v1820_v39 = vsub.f32 1.0, %v2570_v5 }
 0xb5c   : > { %v1819_v11 = vsub.f32 1.0, %v2572_v10 }
 0xbad   : > { %v1652_v62 = vpop.permute.xlu1 %1651 }
 0xbae   : > { %v1657_v7 = vmul.f32 %v2568_v2, %v1652_v62 }
 0xbaf   : > { %v1654_v63 = vpop.permute.xlu0 %1653 }
 0xbb0   : > { %v1658_v0 = vmul.f32 %v2566_v61, %v1654_v63 }
 0xbb1   : > { %v1800_v9 = vpop.permute.xlu1 %1799 }
 0xbb2   : > { %1663 = vrot.lane.b32.xlu0 %v1658_v0, %s2622_s15  ;;  %v1805_v13 = vmul.f32 %v2572_v10, %v1800_v9  ;;  %v2184_v9 = vld [vmem:[%s3294_s20] ss:$0 sm:$0xff] (%p1563_p0) }
 0xbb3   : > { %v1802_v6 = vpop.permute.xlu0 %1801 }
 0xbb4   : > { %v1806_v8 = vmul.f32 %v2570_v5, %v1802_v6 }
 0xbb6   : > { %1811 = vrot.lane.b32.xlu1 %v1806_v8, %s2622_s15  ;;  %1661 = vrot.lane.b32.xlu0 %v1657_v7, %s2622_s15  ;;  %v2581_v7 = vld [vmem:[%s3293_s19] sm:$0xff] (%p1563_p0)  }
 0xbb7   :  { %v2582_v8 = vld [vmem:[%s3292_s18] sm:$0xff] (%p1563_p0)   ;;  %2444 = vmatpush3.bf16.msra.mxu0 (%p1563_p0), %v2581_v7  ;;  %s2625_s18 = smov (%p1563_p0), [#allocation8]  }
 0xbb8   :  { %2452 = vmatpush3.bf16.msra.mxu1 (%p1563_p0), %v2582_v8  ;;  %2445 = vmatprep.subr.bf16.mxu0 (%p1563_p0), %v2617_v1  ;;  %s2003_s9 = sshll.u32 (%p1563_p0), %s2625_s18, 4  ;;  %s2004_s9 = int_to_ptr.vmem [resolvable:$true] %s2003_s9 }
 0xbb9   :  { %2453 = vmatprep.subr.bf16.mxu1 (%p1563_p0), %v2617_v1  ;;  %s2585_s11 = scalar_lea.vmem (%p1563_p0), %s2004_s9, 256  ;;  %p2590_p2 = scmp.lt.s32.totalorder (%p1563_p0), %s2004_s9, %s2004_s9 }
 0xbba   : > { %1809 = vrot.lane.b32.xlu1 %v1805_v13, %s2622_s15  ;;  %p2586_p1 = scmp.ne.s32.totalorder (%p1563_p0), %s2004_s9, %s2585_s11  ;;  %p2591_p3 = scmp.lt.s32.totalorder (%p1563_p0), %s2585_s11, %s2585_s11 }
 0xbbb   :  { %2446 = vmatpush3.bf16.msra.mxu0 (%p1563_p0), %v2583_v49 }
 0xbbc   :  { %2454 = vmatpush3.bf16.msra.mxu1 (%p1563_p0), %v2584_v50  ;;  %p2592_p4 = por (%p1563_p0), %p2591_p3, %p2590_p2 }
 0xbbe   : > { %1687 = vrot.lane.b32.xlu1 %v1684_v14, %s2623_s28  ;;  %p2593_p5 = pnand (%p1563_p0), %p2592_p4, %p2586_p1 }
 0xbc2   : > { %1835 = vrot.lane.b32.xlu1 %v1832_v15, %s2623_s28 }
 0xbc6   : > { %1685 = vrot.lane.b32.xlu1 %v3187_v18, %s2623_s28 }
 0xbca   : > { %1833 = vrot.lane.b32.xlu1 %v3191_v20, %s2623_s28 }
 0xc24   : > { %v1664_v16 = vpop.permute.xlu0 %1663 }
 0xc25   : > { %v1668_v22 = vadd.f32 %v1664_v16, %v1569_v34 }
 0xc28   : > { %v1662_v17 = vpop.permute.xlu0 %1661  ;;  %v1812_v21 = vpop.permute.xlu1 %1811 }
 0xc29   : > { %v1667_v19 = vadd.f32 %v1662_v17, %v1568_v3  ;;  %v1816_v23 = vadd.f32 %v1812_v21, %v1717_v36  ;;  %v1672_v3 = vsub.f32 1.0, %v2566_v61 }
 0xc2b   : > { %2573 = vtanh.f32 %v1667_v19 }
 0xc2c   : > { %2575 = vtanh.f32 %v1668_v22  ;;  %v1810_v24 = vpop.permute.xlu1 %1809 }
 0xc2d   : > { %2577 = vtanh.f32 %v1816_v23  ;;  %v1815_v25 = vadd.f32 %v1810_v24, %v1716_v40 }
 0xc2f   : > { %2579 = vtanh.f32 %v1815_v25 }
 0xc30   : > { %v1688_v28 = vpop.permute.xlu1 %1687 }
 0xc31   : > { %v1692_v36 = vmul.f32 %v2566_v61, %v1688_v28 }
 0xc34   : > { %v1836_v29 = vpop.permute.xlu1 %1835 }
 0xc35   : > { %v2574_v26 = vpop.eup %2573  ;;  %v1840_v4 = vmul.f32 %v2570_v5, %v1836_v29 }
 0xc36   : > { %1675 = vrot.lane.b32.xlu0 %v2574_v26, %s2624_s5  ;;  %v2576_v27 = vpop.eup %2575 }
 0xc37   : > { %v2578_v18 = vpop.eup %2577 }
 0xc38   : > { %v1686_v30 = vpop.permute.xlu1 %1685 }
 0xc39   : > { %v2580_v20 = vpop.eup %2579  ;;  %v1691_v33 = vmul.f32 %v2568_v2, %v1686_v30 }
 0xc3a   : > { %1677 = vrot.lane.b32.xlu0 %v2576_v27, %s2624_s5 }
 0xc3c   : > { %v1834_v43 = vpop.permute.xlu1 %1833 }
 0xc3d   : > { %v1839_v47 = vmul.f32 %v2572_v10, %v1834_v43 }
 0xc3e   : > { %1825 = vrot.lane.b32.xlu0 %v2578_v18, %s2624_s5 }
 0xc42   : > { %1823 = vrot.lane.b32.xlu0 %v2580_v20, %s2624_s5 }
 0xca8   : > { %v1676_v32 = vpop.permute.xlu0 %1675 }
 0xca9   : > { %v1681_v44 = vmul.f32 %v1676_v32, %v1671_v31 }
 0xcab   : > { %v1693_v34 = vadd.f32 %v1691_v33, %v1681_v44 }
 0xcac   : > { %v1678_v35 = vpop.permute.xlu0 %1677 }
 0xcad   : > { %v1682_v37 = vmul.f32 %v1678_v35, %v1672_v3  ;;  %1704 = vrot.lane.b32.xlu1 %v1693_v34, %s2624_s5 }
 0xcaf   : > { %v1694_v38 = vadd.f32 %v1692_v36, %v1682_v37 }
 0xcb0   : > { %v1826_v40 = vpop.permute.xlu0 %1825 }
 0xcb1   : > { %v1697_v41 = vrot.slane %v1694_v38, 7  ;;  %v1830_v42 = vmul.f32 %v1826_v40, %v1820_v39  ;;  %1706 = vrot.lane.b32.xlu0 %v1694_v38, %s2624_s5 }
 0xcb3   : > { %v1842_v45 = vadd.f32 %v1840_v4, %v1830_v42  ;;  %v1699_v12 = vsel %vm1698_vm12, %v1697_v41, %v1693_v34 }
 0xcb4   : > { %v1824_v46 = vpop.permute.xlu0 %1823 }
 0xcb5   : > { %v1829_v48 = vmul.f32 %v1824_v46, %v1819_v11  ;;  %1700 = vrot.lane.b32.xlu0 %v1699_v12, %s2624_s5  ;;  %v1845_v59 = vrot.slane %v1842_v45, 7 }
 0xcb7   : > { %v1841_v60 = vadd.f32 %v1839_v47, %v1829_v48 }
 0xcb9   : > { %1851 = vrot.lane.b32.xlu0 %v1841_v60, %s2624_s5  ;;  %v1846_v61 = vsel %vm1698_vm12, %v1845_v59, %v1841_v60 }
 0xcba   : > { %1847 = vrot.lane.b32.xlu1 %v1846_v61, %s2624_s5 }
 0xcbe   : > { %1853 = vrot.lane.b32.xlu1 %v1842_v45, %s2624_s5 }
 0xd1f   : > { %v1705_v62 = vpop.permute.xlu1 %1704 }
 0xd20   : > { %1712 = vst.msk [vmem:[%s1710_s22] sm:$0x1] %vm1711_vm13, %v1705_v62 }
 0xd23   : > { %v1707_v63 = vpop.permute.xlu0 %1706 }
 0xd24   : > { %1713 = vst.msk [vmem:[%s1710_s22 + $0x8] sm:$0x1] %vm1711_vm13, %v1707_v63 }
 0xd27   : > { %v1701_v0 = vpop.permute.xlu0 %1700 }
 0xd28   : > { %1703 = vst.msk [vmem:[#allocation4] sm:$0x3] %vm1558_vm9, %v1701_v0 }
 0xd2b   : > { %v1852_v2 = vpop.permute.xlu0 %1851  ;;  %v1860_v53 = vld [vmem:[#allocation6] sm:$0xff] (%p1563_p0)  ;;  %v1861_v54 = vld [vmem:[#allocation6 + $0x8] sm:$0xff] (%p1563_p0) }
 0xd2c   : > { %1858 = vst.msk [vmem:[%s1857_s7] sm:$0x1] %vm1711_vm13, %v1852_v2  ;;  %v1848_v5 = vpop.permute.xlu1 %1847  ;;  %v1862_v56 = vpack.c.bf16 (%p1563_p0), %v1861_v54, %v1860_v53 }
 0xd2d   : > { %1850 = vst.msk [vmem:[#allocation5] sm:$0x3] %vm1558_vm9, %v1848_v5  ;;  %1565 = sbr.rel (!%p1563_p0) target bundleno = 2652 (0xa5c), region = 128 }
 0xd2e   :  { %2456 = vmatmul.mubr.msk.bf16.vlgmr.msra.gmra.mrb[0].mxu1 (%p1563_p0), %vm742_vm8, %v1862_v56 }
 0xd30   : > { %v1854_v6 = vpop.permute.xlu1 %1853 }
 0xd31   : > { %1859 = vst.msk [vmem:[%s1857_s7 + $0x8] sm:$0x1] %vm1711_vm13, %v1854_v6 }
 0xd38   :  { %v1867_v51 = vld [vmem:[#allocation7] sm:$0xff]  ;;  %v1868_v52 = vld [vmem:[#allocation7 + $0x8] sm:$0xff] }
 0xd39   :  { %v1869_v55 = vpack.c.bf16 %v1868_v52, %v1867_v51 }
 0xd3b   :  { %2448 = vmatmul.mubr.msk.bf16.vlgmr.msra.gmra.mrb[0].mxu0 %vm742_vm8, %v1869_v55 }
 0xe01   :  { %v1979_v58 = vpop.f32.mrb[0].mxu1 }
 0xe02   :  { %v2457_v13 = vpop.f32.mrb[1].mxu1 }
 0xe03   :  { %v1982_v15 = vpop.f32.mrb[2].mxu1 }
 0xe04   :  { %v2458_v21 = vpop.f32.mrb[3].mxu1 }
 0xe0e   :  { %v1923_v57 = vpop.f32.mrb[0].mxu0 }
 0xe0f   :  { %v2449_v10 = vpop.f32.mrb[1].mxu0  ;;  %v1980_v1 = vadd.f32 %v1979_v58, %v1923_v57 }
 0xe10   :  { %v1926_v14 = vpop.f32.mrb[2].mxu0 }
 0xe11   :  { %v2450_v16 = vpop.f32.mrb[3].mxu0  ;;  %v1993_v17 = vadd.f32 %v2184_v9, %v1980_v1  ;;  %v1983_v19 = vadd.f32 %v1982_v15, %v1926_v14 }
 0xe13   :  { %1996 = vst.msk [vmem:[#allocation8] sm:$0xff] %vm1995_vm14, %v1993_v17  ;;  %v1994_v22 = vadd.f32 %v2184_v9, %v1983_v19 }
 0xe15   :  { %1997 = vst.msk [vmem:[#allocation8 + $0x8] sm:$0xff] %vm1995_vm14, %v1994_v22 }
 0xe16   :  { %2596 = shalt.err (!%p2593_p5)
}
 0xe17   :  { %s2597_s13 = scalar_lea.hbm %s3295_s21, 256 }
 0xe18   :  { %p2598_p6 = scmp.ne.s32.totalorder %s3295_s21, %s2597_s13  ;;  %p2601_p7 = scmp.lt.u32.totalorder %s2597_s13, %s3295_s21 }
 0xe1a   :  { %p2603_p8 = pnand %p2601_p7, %p2598_p6 }
 0xe1c   :  { %2606 = shalt.err (!%p2603_p8)
}
 0xe1d   :  { %s2626_s10 = smov 128   ;;  %s2627_s12 = smov 8  }
 0xe1e   :  { %2009 = dma.vmem_to_hbm [thread:$0]  %s2004_s9, 256, %s3295_s21, [#allocation9], %s2626_s10, %s2626_s10, %s2627_s12  }
 0xe1f   :  { %2611 = dma.done.wait [#allocation9], 256  }
 0xe20   :  { %2612 = vsyncadd [#allocation9], 4294967040 }
 0xe21   :  { %2013 = vsyncpa [#allocation9], 1 }

</bundles_post_ra>
